<compile_context>
chip_gen: v7x
topology: tpu7x:2x2x1
jax: 0.10.0
libtpu: 0.0.40
codegen_flags: <defaults>
</compile_context>

<pallas_src>
import functools

import jax
import jax.numpy as jnp
from jax.experimental import pallas as pl
from jax.experimental.pallas import tpu as pltpu


_MAX_LANE_WIDTH = 4096                 # lane-dense last dim, multiple of 128
_SMALL_BYPASS_BYTES = 256 * 1024       # below this, plain XLA is faster
_VMEM_LIMIT_BYTES = 48 * 1024 * 1024   # covers v5e scoped default, < v7x 64 MiB


def _linreg_kernel(w_ref, b_ref, x_ref, o_ref, *, compute_dtype):
    # w_ref / b_ref are (1, 1) f32 scalars in SMEM; x_ref / o_ref are VMEM tiles.
    w = w_ref[0, 0].astype(compute_dtype)
    b = b_ref[0, 0].astype(compute_dtype)
    # One fused multiply-add per vreg; cast once on store.
    o_ref[...] = (w * x_ref[...] + b).astype(o_ref.dtype)


def _is_v5_device():
    try:
        return "v5" in jax.devices()[0].device_kind.lower()
    except Exception:
        return False


def _round_up(n, m):
    return ((n + m - 1) // m) * m


def linear_regression_forward(x, weights, bias):
    """Elementwise y = weights * x + bias with scalar weights/bias (shape (1,))."""
    orig_shape = x.shape
    in_dtype = x.dtype
    # PyTorch promotes float32 params * integer tensor -> float32 result.
    if jnp.issubdtype(in_dtype, jnp.floating):
        out_dtype = in_dtype
    else:
        out_dtype = jnp.float32

    n = x.size
    itemsize = jnp.dtype(in_dtype).itemsize

    w_scalar = jnp.asarray(weights).reshape(()).astype(jnp.float32)
    b_scalar = jnp.asarray(bias).reshape(()).astype(jnp.float32)

    # ---- small-input bypass: pallas_call fixed cost dominates tiny tensors ----
    if n == 0 or n * itemsize < _SMALL_BYPASS_BYTES:
        return (w_scalar * x + b_scalar).astype(out_dtype).reshape(orig_shape)

    is_v5 = _is_v5_device()

    # bf16-native math on v6e/v7x (bf16 VPU); promote on v5e / other dtypes.
    if in_dtype == jnp.bfloat16 and not is_v5:
        compute_dtype = jnp.bfloat16
    else:
        compute_dtype = jnp.float32

    # ~8 MiB blocks on v6e/v7x, ~4 MiB on v5e (per-step overhead already <4% there).
    target_block_bytes = (4 if is_v5 else 8) * 1024 * 1024

    x_flat = x.reshape(-1)  # free bitcast for default layout

    # ---- lane-dense (rows, lane_w) layout WITHOUT padding ----
    if n % 128 == 0:
        # Largest multiple of 128 (<= _MAX_LANE_WIDTH) that divides n exactly.
        d = _MAX_LANE_WIDTH // 128
        while (n // 128) % d:
            d -= 1
        lane_w = 128 * d
        main_n = n
    else:
        # n >= 64K elements here (bypass guard), so n >= lane_w. Kernel covers the
        # main multiple-of-lane_w prefix; the (< lane_w element) tail is plain XLA.
        lane_w = _MAX_LANE_WIDTH
        main_n = (n // lane_w) * lane_w

    rows = main_n // lane_w
    out_itemsize = jnp.dtype(out_dtype).itemsize
    io_itemsize = max(itemsize, out_itemsize)

    # Packed-sublane multiple: 8 rows for 32-bit, 16 for bf16/fp16, 32 for int8.
    sublane = 8 * max(1, 4 // itemsize)

    cap_rows = max(
        sublane,
        (target_block_bytes // (lane_w * io_itemsize) // sublane) * sublane,
    )
    slab_bytes = rows * lane_w * io_itemsize

    if rows > cap_rows:
        tile_rows = cap_rows
    elif slab_bytes >= 2 * 1024 * 1024 and rows >= 2 * sublane:
        # Keep >= 2 grid blocks so v7x's two TensorCores both get work and
        # the input/output DMA pipeline has something to overlap with.
        tile_rows = max(sublane, _round_up((rows + 1) // 2, sublane))
    else:
        tile_rows = rows  # full-dim block is always a legal block shape

    grid = (pl.cdiv(rows, tile_rows),)
    # NOTE: if rows % tile_rows != 0 the last block is partial: the out-of-range
    # rows carry stale/padded data through the multiply-add, but Pallas masks the
    # writeback so only in-range rows reach HBM (exercised by the tests below).

    x2 = (x_flat if main_n == n else x_flat[:main_n]).reshape(rows, lane_w)

    w2 = w_scalar.reshape(1, 1)
    b2 = b_scalar.reshape(1, 1)

    kernel = functools.partial(_linreg_kernel, compute_dtype=compute_dtype)

    out2 = pl.pallas_call(
        kernel,
        out_shape=jax.ShapeDtypeStruct((rows, lane_w), out_dtype),
        grid_spec=pltpu.PrefetchScalarGridSpec(
            num_scalar_prefetch=0,
            grid=grid,
            in_specs=[
                pl.BlockSpec(memory_space=pltpu.SMEM),        # weights (1,1) f32
                pl.BlockSpec(memory_space=pltpu.SMEM),        # bias    (1,1) f32
                pl.BlockSpec((tile_rows, lane_w), lambda i: (i, 0)),
            ],
            out_specs=pl.BlockSpec((tile_rows, lane_w), lambda i: (i, 0)),
        ),
        compiler_params=pltpu.CompilerParams(
            dimension_semantics=("parallel",),
            vmem_limit_bytes=_VMEM_LIMIT_BYTES,
        ),
    )(w2, b2, x2)

    if main_n == n:
        return out2.reshape(orig_shape)

    # Tail: fewer than lane_w elements — negligible next to the main slab.
    tail = x_flat[main_n:]
    tail_out = (w_scalar * tail + b_scalar).astype(out_dtype)
    return jnp.concatenate([out2.reshape(-1), tail_out]).reshape(orig_shape)


if __name__ == "__main__":
    key = jax.random.PRNGKey(0)
    kx, kbig, ktail, kbf, kw, kb = jax.random.split(key, 6)

    # Parameters mirroring nn.Parameter(torch.randn(1)).
    weights = jax.random.normal(kw, (1,), dtype=jnp.float32)
    bias = jax.random.normal(kb, (1,), dtype=jnp.float32)

    def ref(x):
        return weights[0] * x + bias[0]

    # 1) Small canonical input (2,4,16,16) -> small-input bypass path.
    x = jax.random.normal(kx, (2, 4, 16, 16), dtype=jnp.float32)
    y = jax.block_until_ready(linear_regression_forward(x, weights, bias))
    assert y.shape == x.shape
    assert jnp.allclose(y, ref(x), atol=1e-6, rtol=1e-6), "mismatch (bypass path)"

    # 2) Medium input, n % 128 == 0 -> kernel path, >=2 grid blocks, partial
    #    last block (exercises the masked writeback).
    x_big = jax.random.normal(kbig, (1024, 520), dtype=jnp.float32)
    y_big = jax.block_until_ready(linear_regression_forward(x_big, weights, bias))
    assert y_big.shape == x_big.shape
    assert jnp.allclose(y_big, ref(x_big), atol=1e-6, rtol=1e-6), "mismatch (kernel path)"

    # 3) Medium input, n NOT a multiple of 128 -> kernel on main prefix + XLA tail.
    x_tail = jax.random.normal(ktail, (517, 333), dtype=jnp.float32)
    y_tail = jax.block_until_ready(linear_regression_forward(x_tail, weights, bias))
    assert y_tail.shape == x_tail.shape
    assert jnp.allclose(y_tail, ref(x_tail), atol=1e-6, rtol=1e-6), "mismatch (tail path)"

    # 4) bf16 input -> kernel path with (on v6e/v7x) bf16-native math.
    x_bf = jax.random.normal(kbf, (256, 1024), dtype=jnp.bfloat16)
    y_bf = jax.block_until_ready(linear_regression_forward(x_bf, weights, bias))
    y_bf_ref = (weights[0] * x_bf.astype(jnp.float32)
                + bias[0]).astype(jnp.bfloat16)
    assert y_bf.shape == x_bf.shape
    assert jnp.allclose(y_bf.astype(jnp.float32), y_bf_ref.astype(jnp.float32),
                        atol=3e-2, rtol=3e-2), "mismatch (bf16 path)"

    print("KERNEL_OK")
</pallas_src>

<mosaic_0001>
module attributes {stable_mosaic.version = 11 : i64} {
  func.func @_linreg_kernel(%arg0: i32, %arg1: memref<1x1xf32, #tpu.memory_space<smem>>, %arg2: memref<1x1xf32, #tpu.memory_space<smem>>, %arg3: memref<72x4096xf32, #tpu.memory_space<vmem>>, %arg4: memref<72x4096xf32, #tpu.memory_space<vmem>>) attributes {dimension_semantics = [#tpu.dimension_semantics<parallel>], iteration_bounds = array<i64: 2>, scalar_prefetch = 0 : i64, scratch_operands = 0 : i64, tpu.core_type = #tpu.core_type<tc>, window_params = [{transform_indices = @transform_0, window_bounds = array<i64: 1, 1>}, {transform_indices = @transform_1, window_bounds = array<i64: 1, 1>}, {transform_indices = @transform_2, window_bounds = array<i64: 72, 4096>}, {transform_indices = @transform_3, window_bounds = array<i64: 72, 4096>}]} {
    %c0 = arith.constant 0 : index
    %c0_0 = arith.constant 0 : index
    %0 = memref.load %arg1[%c0, %c0_0] : memref<1x1xf32, #tpu.memory_space<smem>>
    %c0_1 = arith.constant 0 : index
    %c0_2 = arith.constant 0 : index
    %1 = memref.load %arg2[%c0_1, %c0_2] : memref<1x1xf32, #tpu.memory_space<smem>>
    %c0_3 = arith.constant 0 : index
    %c0_4 = arith.constant 0 : index
    %2 = vector.load %arg3[%c0_3, %c0_4] : memref<72x4096xf32, #tpu.memory_space<vmem>>, vector<72x4096xf32>
    %3 = vector.broadcast %0 : f32 to vector<72x4096xf32>
    %4 = arith.mulf %3, %2 : vector<72x4096xf32>
    %5 = vector.broadcast %1 : f32 to vector<72x4096xf32>
    %6 = arith.addf %4, %5 : vector<72x4096xf32>
    %c0_5 = arith.constant 0 : index
    %c0_6 = arith.constant 0 : index
    %7 = vector.load %arg4[%c0_5, %c0_6] : memref<72x4096xf32, #tpu.memory_space<vmem>>, vector<72x4096xf32>
    tpu.vector_store %arg4[%c0_5, %c0_6], %6 {strides = array<i32>} : memref<72x4096xf32, #tpu.memory_space<vmem>>, vector<72x4096xf32>,
    return
  }
  func.func @transform_0(%arg0: i32) -> (i32, i32) {
    %c0_i32 = arith.constant 0 : i32
    %c0_i32_0 = arith.constant 0 : i32
    %c0_i32_1 = arith.constant 0 : i32
    return %c0_i32, %c0_i32_0 : i32, i32
  }
  func.func @transform_1(%arg0: i32) -> (i32, i32) {
    %c0_i32 = arith.constant 0 : i32
    %c0_i32_0 = arith.constant 0 : i32
    %c0_i32_1 = arith.constant 0 : i32
    return %c0_i32, %c0_i32_0 : i32, i32
  }
  func.func @transform_2(%arg0: i32) -> (i32, i32) {
    %c0_i32 = arith.constant 0 : i32
    %c0_i32_0 = arith.constant 0 : i32
    return %arg0, %c0_i32 : i32, i32
  }
  func.func @transform_3(%arg0: i32) -> (i32, i32) {
    %c0_i32 = arith.constant 0 : i32
    %c0_i32_0 = arith.constant 0 : i32
    return %arg0, %c0_i32 : i32, i32
  }
}

</mosaic_0001>

<bundles_post_ra>
// kernel: tpu_custom_call.1
= control target key start
LH: loop header
LB: loop body
LE: loop exit
PB: predicated region body
PF: predicated region fallthrough
CT: control target
= control target key end

     0   :  { %s2998_s0 = inlined_call_operand.<no memory space> [shape: f32[1,1], index: 0, kind: input, shape index: {}]   ;;  %s2999_s1 = inlined_call_operand.<no memory space> [shape: f32[1,1], index: 1, kind: input, shape index: {}]   ;;  %s3000_s2 = inlined_call_operand.hbm [shape: f32[130,4096], index: 2, kind: input, shape index: {}]   ;;  %s3001_s3 = inlined_call_operand.hbm [shape: f32[130,4096], index: 3, kind: output, shape index: {}]  }
   0x1   :  { %8 = sst [smem:[#allocation2]] %s2998_s0 }
   0x2   :  { %9 = sst [smem:[#allocation3]] %s2999_s1 }
   0x3   :  { %10 = vsyncpa [#allocation5], 0 }
   0x4   :  { %12 = vsyncpa [#allocation5 + $0x1], 0 }
   0x5   :  { %13 = vsyncpa [#allocation6], 0 }
   0x6   :  { %15 = vsyncpa [#allocation6 + $0x1], 0  ;;  %s1663_s16 = smov 0   ;;  %s1665_s17 = smov 0  }
   0x7   :  { %s1667_s18 = smov 0   ;;  %s1669_s19 = smov 0  }
   0x8 LB: > { %s1684_s0 = sadd.s32 4294967295, %s1629_s19   ;;  %s1462_s1 = sadd.s32 4294967294, %s1629_s19   ;;  %s1629_s19 = sphi %s1669_s19, %s3011_s19   ;;  %s1625_s18 = sphi %s1667_s18, %s3010_s18   ;;  %s1621_s17 = sphi %s1665_s17, %s3009_s17   ;;  %s1617_s16 = sphi %s1663_s16, %s3008_s16  }
   0x9   : > { %s1688_s20 = sadd.s32 1, %s1629_s19   ;;  %s70_s21 = sadd.s32 1, %s1625_s18 }
   0xa   : > { %s67_s22 = ssub.s32 %s1629_s19, %s1688_s20  ;;  %p77_p0 = scmp.ne.s32.totalorder %s1625_s18, %s1621_s17 }
   0xb   : > { %p68_p1 = scmp.eq.s32.totalorder %s67_s22, 0  ;;  %p78_p2 = scmp.eq.s32.totalorder %s1629_s19, 0 }
   0xc   : > { %p83_p3 = scmp.ne.s32.totalorder %s1621_s17, %s1617_s16  ;;  %p84_p4 = scmp.eq.s32.totalorder %s1684_s0, 0 }
   0xd   : > { %s1700_s23 = scalar_select %p68_p1, %s1625_s18, %s70_s21  }
   0xe   : > { %p79_p5 = por %p78_p2, %p77_p0  ;;  %p1702_p6 = por %p84_p4, %p83_p3 }
   0xf   : > { %p107_p7 = scmp.eq.s32.totalorder %s1684_s0, 1  ;;  %p113_p8 = scmp.eq.s32.totalorder %s1462_s1, 1 }
  0x10   : > { %p3002_p11 = scmp.ge.s32.totalorder %s1629_s19, 2 }
  0x11   : > { %p1707_p9 = por %p107_p7, %p77_p0  ;;  %p1711_p10 = por %p113_p8, %p83_p3 }
  0x12   : > { %135 = sbr.rel (%p3002_p11) target bundleno = 60 (0x3c), region = 24 }
  0x13   : > { %s3005_s26 = scalar_select %p1711_p10, 1, 0 }
  0x19   : > { %138 = sbr.rel (!%p79_p5) target bundleno = 60 (0x3c), region = 28  ;;  %s139_s27 = sand.u32 (%p79_p5), 1, %s1625_s18  }
  0x1a   : > { %s144_s28 = smul.u32 (%p79_p5), 9, %s1629_s19  ;;  %s1723_s6 = scalar_lea.sflag (%p79_p5), [#allocation5], %s139_s27 }
  0x1b   : > { %s1490_s29 = smul.u32 (%p79_p5), 2304, %s139_s27 }
  0x1c   : > { %s145_s30 = ssub.s32 (%p79_p5), 17, %s144_s28 }
  0x1d   : > { %p146_p12 = scmp.lt.s32.totalorder (%p79_p5), %s145_s30, 9  ;;  %s143_s7 = scalar_lea.vmem (%p79_p5), [#allocation4], %s1490_s29 }
  0x20   : > { %s3013_s30 = smov (!%p146_p12, %s145_s30), 9 }
  0x21   : > { %s1720_s4 = sshll.u32 %s3013_s30, 12 }
  0x22   : > { %s151_s5 = ssub.s32 36864, %s1720_s4 }
  0x23   : > { %152 = vsyncadd %s1723_s6, %s151_s5  ;;  %p1467_p13 = scmp.ne.s32.totalorder %s1720_s4, 0  ;;  %s1488_s8 = smul.u32 36864, %s1629_s19 }
  0x24   : > { %s158_s9 = sshll.u32 %s143_s7, 4  ;;  %s1539_s1 = scalar_lea.hbm %s3000_s2, 69632  ;;  %s1733_s9 = int_to_ptr.vmem [resolvable:$true] %s158_s9 }
  0x25   : > { %s1731_s12 = scalar_lea.hbm %s3000_s2, %s1488_s8 }
  0x26   : > { %s1535_s13 = scalar_lea.hbm %s1731_s12, %s1720_s4  ;;  %p1540_p3 = scmp.lt.u32.totalorder %s1731_s12, %s3000_s2 }
  0x27   : > { %p1536_p0 = scmp.ne.s32.totalorder %s1731_s12, %s1535_s13  ;;  %p1541_p4 = scmp.lt.u32.totalorder %s1539_s1, %s1535_s13 }
  0x28   : > { %p1543_p7 = scmp.lt.u32.totalorder %s1535_s13, %s1731_s12 }
  0x29   : > { %p1537_p1 = pnand %p1536_p0, %p1467_p13  ;;  %p1542_p5 = por %p1541_p4, %p1540_p3 }
  0x2b   : > { %p1538_p2 = pneg %p1537_p1  ;;  %p1544_p8 = por %p1543_p7, %p1542_p5 }
  0x2d   : > { %p1545_p12 = pnand %p1544_p8, %p1538_p2 }
  0x2f   : > { %1548 = shalt.err (!%p1545_p12)
}
  0x30   : > { %s1549_s27 = scalar_lea.vmem %s1733_s9, %s1720_s4  ;;  %s1631_s28 = smov [#allocation4]  }
  0x31   : > { %p1550_p0 = scmp.ne.s32.totalorder %s1733_s9, %s1549_s27  ;;  %s1553_s29 = sshll.u32 %s1631_s28, 4  ;;  %s1554_s29 = int_to_ptr.vmem [resolvable:$false] %s1553_s29 }
  0x32   : > { %s1555_s30 = scalar_lea.vmem %s1554_s29, 73728  ;;  %p1556_p10 = scmp.lt.s32.totalorder %s1733_s9, %s1554_s29 }
  0x33   : > { %p1551_p1 = pnand %p1550_p0, %p1467_p13  ;;  %p1557_p3 = scmp.lt.s32.totalorder %s1555_s30, %s1549_s27 }
  0x35   : > { %p1552_p11 = pneg %p1551_p1  ;;  %p1558_p4 = por %p1557_p3, %p1556_p10 }
  0x37   : > { %p1559_p5 = pnand %p1558_p4, %p1552_p11 }
  0x39   : > { %1562 = shalt.err (!%p1559_p5)
}
  0x3a   : > { %s1632_s5 = smov 4096   ;;  %s1633_s7 = smov 256  }
  0x3b   : > { %164 = dma.hbm_to_vmem [thread:$0]  (%p1467_p13), %s1731_s12, %s1720_s4, %s1733_s9, %s1723_s6, %s1632_s5, %s1632_s5, %s1633_s7  }
  0x3c PF: > { %p1472_p2 = scmp.ge.s32.totalorder %s1629_s19, 1  ;;  %p166_p7 = scmp.lt.s32.totalorder %s1629_s19, 3 }
  0x3e   : > { %p167_p8 = pnand %p1472_p2, %p166_p7 }
  0x3f   : > { %s1763_s8 = sand.u32 (!%p167_p8), 1, %s1621_s17  }
  0x40   : > { %170 = sbr.rel (%p167_p8) target bundleno = 283 (0x11b), region = 32  ;;  %s173_s11 = scalar_lea.sflag (!%p167_p8), [#allocation5], %s1763_s8 }
  0x41   : > { %s1491_s10 = smul.u32 (!%p167_p8), 2304, %s1763_s8 }
  0x43   : > { %s1769_s13 = scalar_lea.vmem (!%p167_p8), [#allocation4], %s1491_s10 }
  0x47   : > { %1608 = dma.done.wait (%p1702_p6), %s173_s11, 36864  }
  0x48   : > { %1610 = vsyncadd (%p1702_p6), %s173_s11, 4294930432  ;;  %s211_s4 = sld [smem:[#allocation2]]  ;;  %v213_v0 = vld [vmem:[%s1769_s13] sm:$0xff]  ;;  %v214_v3 = vld [vmem:[%s1769_s13 + $0x8] sm:$0xff]  ;;  %s1808_s24 = scalar_lea.vmem [#allocation7], %s1491_s10 }
  0x49   : > { %s212_s6 = sld [smem:[#allocation3]]  ;;  %v215_v6 = vld [vmem:[%s1769_s13 + $0x10] sm:$0xff]  ;;  %v216_v7 = vld [vmem:[%s1769_s13 + $0x18] sm:$0xff]  ;;  %v217_v8 = vld [vmem:[%s1769_s13 + $0x20] sm:$0xff]  ;;  %s1368_s9 = scalar_lea.sflag [#allocation6], %s1763_s8 }
  0x4a   : > { %v218_v12 = vld [vmem:[%s1769_s13 + $0x28] sm:$0xff]  ;;  %v219_v13 = vld [vmem:[%s1769_s13 + $0x30] sm:$0xff]  ;;  %v220_v14 = vld [vmem:[%s1769_s13 + $0x38] sm:$0xff]  ;;  %s1375_s12 = smul.u32 (%p1707_p9), 9, %s1684_s0 }
  0x4b   : > { %v221_v19 = vld [vmem:[%s1769_s13 + $0x40] sm:$0xff]  ;;  %v222_v20 = vld [vmem:[%s1769_s13 + $0x48] sm:$0xff]  ;;  %v223_v21 = vld [vmem:[%s1769_s13 + $0x50] sm:$0xff] }
  0x4c   : > { %v224_v26 = vld [vmem:[%s1769_s13 + $0x58] sm:$0xff]  ;;  %v225_v27 = vld [vmem:[%s1769_s13 + $0x60] sm:$0xff]  ;;  %v226_v28 = vld [vmem:[%s1769_s13 + $0x68] sm:$0xff]  ;;  %s1376_s14 = ssub.s32 (%p1707_p9), 17, %s1375_s12 }
  0x4d   : > { %v227_v33 = vld [vmem:[%s1769_s13 + $0x70] sm:$0xff]  ;;  %v228_v34 = vld [vmem:[%s1769_s13 + $0x78] sm:$0xff]  ;;  %v229_v39 = vld [vmem:[%s1769_s13 + $0x80] sm:$0xff]  ;;  %p1377_p6 = scmp.lt.s32.totalorder (%p1707_p9), %s1376_s14, 9 }
  0x4e   : > { %v1776_v1 = vstv %s211_s4  ;;  %v230_v40 = vld [vmem:[%s1769_s13 + $0x88] sm:$0xff]  ;;  %v231_v45 = vld [vmem:[%s1769_s13 + $0x90] sm:$0xff]  ;;  %v232_v46 = vld [vmem:[%s1769_s13 + $0x98] sm:$0xff] }
  0x4f   : > { %v1778_v2 = vstv %s212_s6  ;;  %v502_v4 = vmul.f32 %v1776_v1, %v213_v0  ;;  %v503_v5 = vmul.f32 %v1776_v1, %v214_v3  ;;  %v504_v9 = vmul.f32 %v1776_v1, %v215_v6  ;;  %v233_v47 = vld [vmem:[%s1769_s13 + $0xa0] sm:$0xff]  ;;  %v234_v52 = vld [vmem:[%s1769_s13 + $0xa8] sm:$0xff]  ;;  %v235_v53 = vld [vmem:[%s1769_s13 + $0xb0] sm:$0xff] }
  0x50   : > { %v505_v10 = vmul.f32 %v1776_v1, %v216_v7  ;;  %v506_v11 = vmul.f32 %v1776_v1, %v217_v8  ;;  %v507_v17 = vmul.f32 %v1776_v1, %v218_v12  ;;  %v508_v18 = vmul.f32 %v1776_v1, %v219_v13  ;;  %v236_v58 = vld [vmem:[%s1769_s13 + $0xb8] sm:$0xff]  ;;  %v237_v63 = vld [vmem:[%s1769_s13 + $0xc0] sm:$0xff]  ;;  %v238_v0 = vld [vmem:[%s1769_s13 + $0xc8] sm:$0xff] }
  0x51   : > { %v791_v15 = vadd.f32 %v1778_v2, %v502_v4  ;;  %v792_v16 = vadd.f32 %v1778_v2, %v503_v5  ;;  %v793_v22 = vadd.f32 %v1778_v2, %v504_v9  ;;  %v509_v25 = vmul.f32 %v1776_v1, %v220_v14  ;;  %v239_v7 = vld [vmem:[%s1769_s13 + $0xd0] sm:$0xff]  ;;  %v240_v8 = vld [vmem:[%s1769_s13 + $0xd8] sm:$0xff]  ;;  %v241_v9 = vld [vmem:[%s1769_s13 + $0xe0] sm:$0xff] }
  0x52   : > { %v794_v23 = vadd.f32 %v1778_v2, %v505_v10  ;;  %v795_v24 = vadd.f32 %v1778_v2, %v506_v11  ;;  %v796_v29 = vadd.f32 %v1778_v2, %v507_v17  ;;  %v797_v30 = vadd.f32 %v1778_v2, %v508_v18  ;;  %v242_v14 = vld [vmem:[%s1769_s13 + $0xe8] sm:$0xff] }
  0x53   : > { %1079 = vst [vmem:[%s1808_s24] sm:$0xff] %v791_v15  ;;  %1080 = vst [vmem:[%s1808_s24 + $0x8] sm:$0xff] %v792_v16  ;;  %v510_v31 = vmul.f32 %v1776_v1, %v221_v19  ;;  %v511_v32 = vmul.f32 %v1776_v1, %v222_v20  ;;  %v798_v35 = vadd.f32 %v1778_v2, %v509_v25  ;;  %v243_v15 = vld [vmem:[%s1769_s13 + $0xf0] sm:$0xff]  ;;  %v244_v20 = vld [vmem:[%s1769_s13 + $0xf8] sm:$0xff] }
  0x54   : > { %1081 = vst [vmem:[%s1808_s24 + $0x10] sm:$0xff] %v793_v22  ;;  %1082 = vst [vmem:[%s1808_s24 + $0x18] sm:$0xff] %v794_v23  ;;  %v512_v36 = vmul.f32 %v1776_v1, %v223_v21  ;;  %v513_v37 = vmul.f32 %v1776_v1, %v224_v26  ;;  %v514_v38 = vmul.f32 %v1776_v1, %v225_v27  ;;  %v245_v25 = vld [vmem:[%s1769_s13 + $0x100] sm:$0xff]  ;;  %v246_v26 = vld [vmem:[%s1769_s13 + $0x108] sm:$0xff] }
  0x55   : > { %1083 = vst [vmem:[%s1808_s24 + $0x20] sm:$0xff] %v795_v24  ;;  %1084 = vst [vmem:[%s1808_s24 + $0x28] sm:$0xff] %v796_v29  ;;  %v799_v41 = vadd.f32 %v1778_v2, %v510_v31  ;;  %v800_v42 = vadd.f32 %v1778_v2, %v511_v32  ;;  %v515_v43 = vmul.f32 %v1776_v1, %v226_v28  ;;  %v247_v31 = vld [vmem:[%s1769_s13 + $0x110] sm:$0xff]  ;;  %v248_v32 = vld [vmem:[%s1769_s13 + $0x118] sm:$0xff] }
  0x56   : > { %1085 = vst [vmem:[%s1808_s24 + $0x30] sm:$0xff] %v797_v30  ;;  %v516_v44 = vmul.f32 %v1776_v1, %v227_v33  ;;  %1086 = vst [vmem:[%s1808_s24 + $0x38] sm:$0xff] %v798_v35  ;;  %v801_v48 = vadd.f32 %v1778_v2, %v512_v36  ;;  %v802_v49 = vadd.f32 %v1778_v2, %v513_v37  ;;  %v249_v33 = vld [vmem:[%s1769_s13 + $0x120] sm:$0xff] }
  0x57   : > { %v803_v50 = vadd.f32 %v1778_v2, %v514_v38  ;;  %v517_v51 = vmul.f32 %v1776_v1, %v228_v34  ;;  %1087 = vst [vmem:[%s1808_s24 + $0x40] sm:$0xff] %v799_v41  ;;  %1088 = vst [vmem:[%s1808_s24 + $0x48] sm:$0xff] %v800_v42  ;;  %v804_v54 = vadd.f32 %v1778_v2, %v515_v43  ;;  %v250_v38 = vld [vmem:[%s1769_s13 + $0x128] sm:$0xff] }
  0x58   : > { %v805_v55 = vadd.f32 %v1778_v2, %v516_v44  ;;  %v518_v56 = vmul.f32 %v1776_v1, %v229_v39  ;;  %v519_v57 = vmul.f32 %v1776_v1, %v230_v40  ;;  %1089 = vst [vmem:[%s1808_s24 + $0x50] sm:$0xff] %v801_v48  ;;  %1090 = vst [vmem:[%s1808_s24 + $0x58] sm:$0xff] %v802_v49  ;;  %v251_v39 = vld [vmem:[%s1769_s13 + $0x130] sm:$0xff]  ;;  %v252_v44 = vld [vmem:[%s1769_s13 + $0x138] sm:$0xff] }
  0x59   : > { %1091 = vst [vmem:[%s1808_s24 + $0x60] sm:$0xff] %v803_v50  ;;  %v806_v59 = vadd.f32 %v1778_v2, %v517_v51  ;;  %v520_v60 = vmul.f32 %v1776_v1, %v231_v45  ;;  %v521_v61 = vmul.f32 %v1776_v1, %v232_v46  ;;  %v522_v62 = vmul.f32 %v1776_v1, %v233_v47  ;;  %v253_v49 = vld [vmem:[%s1769_s13 + $0x140] sm:$0xff]  ;;  %v254_v50 = vld [vmem:[%s1769_s13 + $0x148] sm:$0xff] }
  0x5a   : > { %1092 = vst [vmem:[%s1808_s24 + $0x68] sm:$0xff] %v804_v54  ;;  %1093 = vst [vmem:[%s1808_s24 + $0x70] sm:$0xff] %v805_v55  ;;  %v807_v3 = vadd.f32 %v1778_v2, %v518_v56  ;;  %v808_v4 = vadd.f32 %v1778_v2, %v519_v57  ;;  %v523_v5 = vmul.f32 %v1776_v1, %v234_v52  ;;  %v255_v55 = vld [vmem:[%s1769_s13 + $0x150] sm:$0xff]  ;;  %v256_v56 = vld [vmem:[%s1769_s13 + $0x158] sm:$0xff] }
  0x5b   : > { %v524_v6 = vmul.f32 %v1776_v1, %v235_v53  ;;  %1094 = vst [vmem:[%s1808_s24 + $0x78] sm:$0xff] %v806_v59  ;;  %v809_v10 = vadd.f32 %v1778_v2, %v520_v60  ;;  %v810_v11 = vadd.f32 %v1778_v2, %v521_v61  ;;  %v811_v12 = vadd.f32 %v1778_v2, %v522_v62  ;;  %v257_v57 = vld [vmem:[%s1769_s13 + $0x160] sm:$0xff]  ;;  %v258_v62 = vld [vmem:[%s1769_s13 + $0x168] sm:$0xff] }
  0x5c   : > { %v525_v13 = vmul.f32 %v1776_v1, %v236_v58  ;;  %1095 = vst [vmem:[%s1808_s24 + $0x80] sm:$0xff] %v807_v3  ;;  %1096 = vst [vmem:[%s1808_s24 + $0x88] sm:$0xff] %v808_v4  ;;  %v812_v16 = vadd.f32 %v1778_v2, %v523_v5  ;;  %v526_v18 = vmul.f32 %v1776_v1, %v237_v63  ;;  %v259_v63 = vld [vmem:[%s1769_s13 + $0x170] sm:$0xff] }
  0x5d   : > { %v813_v17 = vadd.f32 %v1778_v2, %v524_v6  ;;  %v527_v19 = vmul.f32 %v1776_v1, %v238_v0  ;;  %1097 = vst [vmem:[%s1808_s24 + $0x90] sm:$0xff] %v809_v10  ;;  %1098 = vst [vmem:[%s1808_s24 + $0x98] sm:$0xff] %v810_v11  ;;  %v528_v22 = vmul.f32 %v1776_v1, %v239_v7  ;;  %v260_v6 = vld [vmem:[%s1769_s13 + $0x178] sm:$0xff]  ;;  %v261_v11 = vld [vmem:[%s1769_s13 + $0x180] sm:$0xff] }
  0x5e   : > { %1099 = vst [vmem:[%s1808_s24 + $0xa0] sm:$0xff] %v811_v12  ;;  %v814_v21 = vadd.f32 %v1778_v2, %v525_v13  ;;  %v529_v23 = vmul.f32 %v1776_v1, %v240_v8  ;;  %v530_v24 = vmul.f32 %v1776_v1, %v241_v9  ;;  %1100 = vst [vmem:[%s1808_s24 + $0xa8] sm:$0xff] %v812_v16  ;;  %v262_v12 = vld [vmem:[%s1769_s13 + $0x188] sm:$0xff] }
  0x5f   : > { %1101 = vst [vmem:[%s1808_s24 + $0xb0] sm:$0xff] %v813_v17  ;;  %v815_v27 = vadd.f32 %v1778_v2, %v526_v18  ;;  %v816_v28 = vadd.f32 %v1778_v2, %v527_v19  ;;  %v531_v29 = vmul.f32 %v1776_v1, %v242_v14  ;;  %v532_v30 = vmul.f32 %v1776_v1, %v243_v15  ;;  %v263_v17 = vld [vmem:[%s1769_s13 + $0x190] sm:$0xff]  ;;  %v264_v18 = vld [vmem:[%s1769_s13 + $0x198] sm:$0xff]  ;;  %v265_v19 = vld [vmem:[%s1769_s13 + $0x1a0] sm:$0xff] }
  0x60   : > { %1102 = vst [vmem:[%s1808_s24 + $0xb8] sm:$0xff] %v814_v21  ;;  %v817_v34 = vadd.f32 %v1778_v2, %v528_v22  ;;  %v818_v35 = vadd.f32 %v1778_v2, %v529_v23  ;;  %v819_v36 = vadd.f32 %v1778_v2, %v530_v24  ;;  %v533_v37 = vmul.f32 %v1776_v1, %v244_v20  ;;  %v266_v24 = vld [vmem:[%s1769_s13 + $0x1a8] sm:$0xff] }
  0x61   : > { %1103 = vst [vmem:[%s1808_s24 + $0xc0] sm:$0xff] %v815_v27  ;;  %1104 = vst [vmem:[%s1808_s24 + $0xc8] sm:$0xff] %v816_v28  ;;  %v820_v40 = vadd.f32 %v1778_v2, %v531_v29  ;;  %v821_v41 = vadd.f32 %v1778_v2, %v532_v30  ;;  %v534_v42 = vmul.f32 %v1776_v1, %v245_v25  ;;  %v267_v25 = vld [vmem:[%s1769_s13 + $0x1b0] sm:$0xff]  ;;  %v268_v30 = vld [vmem:[%s1769_s13 + $0x1b8] sm:$0xff] }
  0x62   : > { %v535_v43 = vmul.f32 %v1776_v1, %v246_v26  ;;  %1105 = vst [vmem:[%s1808_s24 + $0xd0] sm:$0xff] %v817_v34  ;;  %1106 = vst [vmem:[%s1808_s24 + $0xd8] sm:$0xff] %v818_v35  ;;  %v822_v45 = vadd.f32 %v1778_v2, %v533_v37  ;;  %v536_v46 = vmul.f32 %v1776_v1, %v247_v31  ;;  %v269_v35 = vld [vmem:[%s1769_s13 + $0x1c0] sm:$0xff] }
  0x63   : > { %1107 = vst [vmem:[%s1808_s24 + $0xe0] sm:$0xff] %v819_v36  ;;  %v537_v47 = vmul.f32 %v1776_v1, %v248_v32  ;;  %v538_v48 = vmul.f32 %v1776_v1, %v249_v33  ;;  %1108 = vst [vmem:[%s1808_s24 + $0xe8] sm:$0xff] %v820_v40  ;;  %v823_v51 = vadd.f32 %v1778_v2, %v534_v42  ;;  %v270_v36 = vld [vmem:[%s1769_s13 + $0x1c8] sm:$0xff]  ;;  %v272_v42 = vld [vmem:[%s1769_s13 + $0x1d8] sm:$0xff] }
  0x64   : > { %1109 = vst [vmem:[%s1808_s24 + $0xf0] sm:$0xff] %v821_v41  ;;  %v824_v52 = vadd.f32 %v1778_v2, %v535_v43  ;;  %v539_v53 = vmul.f32 %v1776_v1, %v250_v38  ;;  %v540_v54 = vmul.f32 %v1776_v1, %v251_v39  ;;  %1110 = vst [vmem:[%s1808_s24 + $0xf8] sm:$0xff] %v822_v45  ;;  %v271_v41 = vld [vmem:[%s1769_s13 + $0x1d0] sm:$0xff]  ;;  %v273_v43 = vld [vmem:[%s1769_s13 + $0x1e0] sm:$0xff] }
  0x65   : > { %v825_v58 = vadd.f32 %v1778_v2, %v536_v46  ;;  %v826_v59 = vadd.f32 %v1778_v2, %v537_v47  ;;  %v827_v60 = vadd.f32 %v1778_v2, %v538_v48  ;;  %v541_v61 = vmul.f32 %v1776_v1, %v252_v44  ;;  %1111 = vst [vmem:[%s1808_s24 + $0x100] sm:$0xff] %v823_v51  ;;  %v274_v48 = vld [vmem:[%s1769_s13 + $0x1e8] sm:$0xff] }
  0x66   : > { %1112 = vst [vmem:[%s1808_s24 + $0x108] sm:$0xff] %v824_v52  ;;  %v828_v0 = vadd.f32 %v1778_v2, %v539_v53  ;;  %v829_v3 = vadd.f32 %v1778_v2, %v540_v54  ;;  %v542_v4 = vmul.f32 %v1776_v1, %v253_v49  ;;  %v543_v5 = vmul.f32 %v1776_v1, %v254_v50  ;;  %v275_v49 = vld [vmem:[%s1769_s13 + $0x1f0] sm:$0xff]  ;;  %v276_v54 = vld [vmem:[%s1769_s13 + $0x1f8] sm:$0xff] }
  0x67   : > { %1113 = vst [vmem:[%s1808_s24 + $0x110] sm:$0xff] %v825_v58  ;;  %1114 = vst [vmem:[%s1808_s24 + $0x118] sm:$0xff] %v826_v59  ;;  %v830_v7 = vadd.f32 %v1778_v2, %v541_v61  ;;  %v544_v8 = vmul.f32 %v1776_v1, %v255_v55  ;;  %v545_v9 = vmul.f32 %v1776_v1, %v256_v56  ;;  %v277_v59 = vld [vmem:[%s1769_s13 + $0x200] sm:$0xff] }
  0x68   : > { %1115 = vst [vmem:[%s1808_s24 + $0x120] sm:$0xff] %v827_v60  ;;  %v546_v10 = vmul.f32 %v1776_v1, %v257_v57  ;;  %1116 = vst [vmem:[%s1808_s24 + $0x128] sm:$0xff] %v828_v0  ;;  %v831_v13 = vadd.f32 %v1778_v2, %v542_v4  ;;  %v832_v14 = vadd.f32 %v1778_v2, %v543_v5  ;;  %v278_v60 = vld [vmem:[%s1769_s13 + $0x208] sm:$0xff]  ;;  %v280_v4 = vld [vmem:[%s1769_s13 + $0x218] sm:$0xff] }
  0x69   : > { %1117 = vst [vmem:[%s1808_s24 + $0x130] sm:$0xff] %v829_v3  ;;  %v547_v15 = vmul.f32 %v1776_v1, %v258_v62  ;;  %v548_v16 = vmul.f32 %v1776_v1, %v259_v63  ;;  %1118 = vst [vmem:[%s1808_s24 + $0x138] sm:$0xff] %v830_v7  ;;  %v833_v20 = vadd.f32 %v1778_v2, %v544_v8  ;;  %v279_v3 = vld [vmem:[%s1769_s13 + $0x210] sm:$0xff]  ;;  %v281_v5 = vld [vmem:[%s1769_s13 + $0x220] sm:$0xff] }
  0x6a   : > { %v834_v21 = vadd.f32 %v1778_v2, %v545_v9  ;;  %v835_v22 = vadd.f32 %v1778_v2, %v546_v10  ;;  %v549_v23 = vmul.f32 %v1776_v1, %v260_v6  ;;  %1119 = vst [vmem:[%s1808_s24 + $0x140] sm:$0xff] %v831_v13  ;;  %1120 = vst [vmem:[%s1808_s24 + $0x148] sm:$0xff] %v832_v14  ;;  %v282_v10 = vld [vmem:[%s1769_s13 + $0x228] sm:$0xff] }
  0x6b   : > { %v836_v26 = vadd.f32 %v1778_v2, %v547_v15  ;;  %v837_v27 = vadd.f32 %v1778_v2, %v548_v16  ;;  %v550_v28 = vmul.f32 %v1776_v1, %v261_v11  ;;  %v551_v29 = vmul.f32 %v1776_v1, %v262_v12  ;;  %1121 = vst [vmem:[%s1808_s24 + $0x150] sm:$0xff] %v833_v20  ;;  %v283_v11 = vld [vmem:[%s1769_s13 + $0x230] sm:$0xff]  ;;  %v284_v16 = vld [vmem:[%s1769_s13 + $0x238] sm:$0xff] }
  0x6c   : > { %1122 = vst [vmem:[%s1808_s24 + $0x158] sm:$0xff] %v834_v21  ;;  %1123 = vst [vmem:[%s1808_s24 + $0x160] sm:$0xff] %v835_v22  ;;  %v838_v31 = vadd.f32 %v1778_v2, %v549_v23  ;;  %v552_v32 = vmul.f32 %v1776_v1, %v263_v17  ;;  %v553_v33 = vmul.f32 %v1776_v1, %v264_v18  ;;  %v285_v21 = vld [vmem:[%s1769_s13 + $0x240] sm:$0xff]  ;;  %v286_v22 = vld [vmem:[%s1769_s13 + $0x248] sm:$0xff] }
  0x6d   : > { %v554_v34 = vmul.f32 %v1776_v1, %v265_v19  ;;  %1124 = vst [vmem:[%s1808_s24 + $0x168] sm:$0xff] %v836_v26  ;;  %1125 = vst [vmem:[%s1808_s24 + $0x170] sm:$0xff] %v837_v27  ;;  %v839_v37 = vadd.f32 %v1778_v2, %v550_v28  ;;  %v840_v38 = vadd.f32 %v1778_v2, %v551_v29  ;;  %v287_v27 = vld [vmem:[%s1769_s13 + $0x250] sm:$0xff]  ;;  %v288_v28 = vld [vmem:[%s1769_s13 + $0x258] sm:$0xff] }
  0x6e   : > { %v555_v39 = vmul.f32 %v1776_v1, %v266_v24  ;;  %v556_v40 = vmul.f32 %v1776_v1, %v267_v25  ;;  %1126 = vst [vmem:[%s1808_s24 + $0x178] sm:$0xff] %v838_v31  ;;  %v841_v44 = vadd.f32 %v1778_v2, %v552_v32  ;;  %v842_v45 = vadd.f32 %v1778_v2, %v553_v33  ;;  %v289_v29 = vld [vmem:[%s1769_s13 + $0x260] sm:$0xff] }
  0x6f   : > { %v843_v46 = vadd.f32 %v1778_v2, %v554_v34  ;;  %v557_v47 = vmul.f32 %v1776_v1, %v268_v30  ;;  %1127 = vst [vmem:[%s1808_s24 + $0x180] sm:$0xff] %v839_v37  ;;  %1128 = vst [vmem:[%s1808_s24 + $0x188] sm:$0xff] %v840_v38  ;;  %v558_v52 = vmul.f32 %v1776_v1, %v269_v35  ;;  %v290_v34 = vld [vmem:[%s1769_s13 + $0x268] sm:$0xff]  ;;  %v291_v35 = vld [vmem:[%s1769_s13 + $0x270] sm:$0xff] }
  0x70   : > { %v844_v50 = vadd.f32 %v1778_v2, %v555_v39  ;;  %v845_v51 = vadd.f32 %v1778_v2, %v556_v40  ;;  %v559_v53 = vmul.f32 %v1776_v1, %v270_v36  ;;  %1129 = vst [vmem:[%s1808_s24 + $0x190] sm:$0xff] %v841_v44  ;;  %1130 = vst [vmem:[%s1808_s24 + $0x198] sm:$0xff] %v842_v45  ;;  %v292_v40 = vld [vmem:[%s1769_s13 + $0x278] sm:$0xff]  ;;  %v293_v45 = vld [vmem:[%s1769_s13 + $0x280] sm:$0xff] }
  0x71   : > { %1131 = vst [vmem:[%s1808_s24 + $0x1a0] sm:$0xff] %v843_v46  ;;  %v846_v55 = vadd.f32 %v1778_v2, %v557_v47  ;;  %v560_v56 = vmul.f32 %v1776_v1, %v271_v41  ;;  %v561_v57 = vmul.f32 %v1776_v1, %v272_v42  ;;  %v562_v58 = vmul.f32 %v1776_v1, %v273_v43  ;;  %v294_v46 = vld [vmem:[%s1769_s13 + $0x288] sm:$0xff] }
  0x72   : > { %1132 = vst [vmem:[%s1808_s24 + $0x1a8] sm:$0xff] %v844_v50  ;;  %1133 = vst [vmem:[%s1808_s24 + $0x1b0] sm:$0xff] %v845_v51  ;;  %v847_v61 = vadd.f32 %v1778_v2, %v558_v52  ;;  %v848_v62 = vadd.f32 %v1778_v2, %v559_v53  ;;  %v563_v63 = vmul.f32 %v1776_v1, %v274_v48  ;;  %v295_v51 = vld [vmem:[%s1769_s13 + $0x290] sm:$0xff]  ;;  %v296_v52 = vld [vmem:[%s1769_s13 + $0x298] sm:$0xff] }
  0x73   : > { %v564_v0 = vmul.f32 %v1776_v1, %v275_v49  ;;  %1134 = vst [vmem:[%s1808_s24 + $0x1b8] sm:$0xff] %v846_v55  ;;  %v849_v6 = vadd.f32 %v1778_v2, %v560_v56  ;;  %v850_v7 = vadd.f32 %v1778_v2, %v561_v57  ;;  %v851_v8 = vadd.f32 %v1778_v2, %v562_v58  ;;  %v297_v53 = vld [vmem:[%s1769_s13 + $0x2a0] sm:$0xff]  ;;  %v298_v58 = vld [vmem:[%s1769_s13 + $0x2a8] sm:$0xff] }
  0x74   : > { %v565_v9 = vmul.f32 %v1776_v1, %v276_v54  ;;  %1135 = vst [vmem:[%s1808_s24 + $0x1c0] sm:$0xff] %v847_v61  ;;  %1136 = vst [vmem:[%s1808_s24 + $0x1c8] sm:$0xff] %v848_v62  ;;  %v852_v12 = vadd.f32 %v1778_v2, %v563_v63  ;;  %v566_v14 = vmul.f32 %v1776_v1, %v277_v59  ;;  %v299_v59 = vld [vmem:[%s1769_s13 + $0x2b0] sm:$0xff] }
  0x75   : > { %v853_v13 = vadd.f32 %v1778_v2, %v564_v0  ;;  %v567_v15 = vmul.f32 %v1776_v1, %v278_v60  ;;  %1137 = vst [vmem:[%s1808_s24 + $0x1d0] sm:$0xff] %v849_v6  ;;  %1138 = vst [vmem:[%s1808_s24 + $0x1d8] sm:$0xff] %v850_v7  ;;  %v568_v18 = vmul.f32 %v1776_v1, %v279_v3  ;;  %v300_v0 = vld [vmem:[%s1769_s13 + $0x2b8] sm:$0xff]  ;;  %v301_v7 = vld [vmem:[%s1769_s13 + $0x2c0] sm:$0xff] }
  0x76   : > { %1139 = vst [vmem:[%s1808_s24 + $0x1e0] sm:$0xff] %v851_v8  ;;  %v854_v17 = vadd.f32 %v1778_v2, %v565_v9  ;;  %v569_v19 = vmul.f32 %v1776_v1, %v280_v4  ;;  %v570_v20 = vmul.f32 %v1776_v1, %v281_v5  ;;  %1140 = vst [vmem:[%s1808_s24 + $0x1e8] sm:$0xff] %v852_v12  ;;  %v302_v8 = vld [vmem:[%s1769_s13 + $0x2c8] sm:$0xff] }
  0x77   : > { %1141 = vst [vmem:[%s1808_s24 + $0x1f0] sm:$0xff] %v853_v13  ;;  %v855_v23 = vadd.f32 %v1778_v2, %v566_v14  ;;  %v856_v24 = vadd.f32 %v1778_v2, %v567_v15  ;;  %v571_v25 = vmul.f32 %v1776_v1, %v282_v10  ;;  %v572_v26 = vmul.f32 %v1776_v1, %v283_v11  ;;  %v303_v13 = vld [vmem:[%s1769_s13 + $0x2d0] sm:$0xff]  ;;  %v304_v14 = vld [vmem:[%s1769_s13 + $0x2d8] sm:$0xff]  ;;  %v305_v15 = vld [vmem:[%s1769_s13 + $0x2e0] sm:$0xff] }
  0x78   : > { %1142 = vst [vmem:[%s1808_s24 + $0x1f8] sm:$0xff] %v854_v17  ;;  %v857_v30 = vadd.f32 %v1778_v2, %v568_v18  ;;  %v858_v31 = vadd.f32 %v1778_v2, %v569_v19  ;;  %v859_v32 = vadd.f32 %v1778_v2, %v570_v20  ;;  %v573_v33 = vmul.f32 %v1776_v1, %v284_v16  ;;  %v306_v20 = vld [vmem:[%s1769_s13 + $0x2e8] sm:$0xff] }
  0x79   : > { %1143 = vst [vmem:[%s1808_s24 + $0x200] sm:$0xff] %v855_v23  ;;  %1144 = vst [vmem:[%s1808_s24 + $0x208] sm:$0xff] %v856_v24  ;;  %v860_v36 = vadd.f32 %v1778_v2, %v571_v25  ;;  %v861_v37 = vadd.f32 %v1778_v2, %v572_v26  ;;  %v574_v38 = vmul.f32 %v1776_v1, %v285_v21  ;;  %v307_v21 = vld [vmem:[%s1769_s13 + $0x2f0] sm:$0xff]  ;;  %v308_v26 = vld [vmem:[%s1769_s13 + $0x2f8] sm:$0xff] }
  0x7a   : > { %v575_v39 = vmul.f32 %v1776_v1, %v286_v22  ;;  %1145 = vst [vmem:[%s1808_s24 + $0x210] sm:$0xff] %v857_v30  ;;  %1146 = vst [vmem:[%s1808_s24 + $0x218] sm:$0xff] %v858_v31  ;;  %v862_v41 = vadd.f32 %v1778_v2, %v573_v33  ;;  %v576_v42 = vmul.f32 %v1776_v1, %v287_v27  ;;  %v309_v31 = vld [vmem:[%s1769_s13 + $0x300] sm:$0xff] }
  0x7b   : > { %1147 = vst [vmem:[%s1808_s24 + $0x220] sm:$0xff] %v859_v32  ;;  %v577_v43 = vmul.f32 %v1776_v1, %v288_v28  ;;  %v578_v44 = vmul.f32 %v1776_v1, %v289_v29  ;;  %1148 = vst [vmem:[%s1808_s24 + $0x228] sm:$0xff] %v860_v36  ;;  %v863_v47 = vadd.f32 %v1778_v2, %v574_v38  ;;  %v310_v32 = vld [vmem:[%s1769_s13 + $0x308] sm:$0xff]  ;;  %v312_v38 = vld [vmem:[%s1769_s13 + $0x318] sm:$0xff] }
  0x7c   : > { %1149 = vst [vmem:[%s1808_s24 + $0x230] sm:$0xff] %v861_v37  ;;  %v864_v48 = vadd.f32 %v1778_v2, %v575_v39  ;;  %v579_v49 = vmul.f32 %v1776_v1, %v290_v34  ;;  %v580_v50 = vmul.f32 %v1776_v1, %v291_v35  ;;  %1150 = vst [vmem:[%s1808_s24 + $0x238] sm:$0xff] %v862_v41  ;;  %v311_v37 = vld [vmem:[%s1769_s13 + $0x310] sm:$0xff]  ;;  %v313_v39 = vld [vmem:[%s1769_s13 + $0x320] sm:$0xff] }
  0x7d   : > { %v865_v54 = vadd.f32 %v1778_v2, %v576_v42  ;;  %v866_v55 = vadd.f32 %v1778_v2, %v577_v43  ;;  %v867_v56 = vadd.f32 %v1778_v2, %v578_v44  ;;  %v581_v57 = vmul.f32 %v1776_v1, %v292_v40  ;;  %1151 = vst [vmem:[%s1808_s24 + $0x240] sm:$0xff] %v863_v47  ;;  %v314_v44 = vld [vmem:[%s1769_s13 + $0x328] sm:$0xff] }
  0x7e   : > { %1152 = vst [vmem:[%s1808_s24 + $0x248] sm:$0xff] %v864_v48  ;;  %v868_v60 = vadd.f32 %v1778_v2, %v579_v49  ;;  %v869_v61 = vadd.f32 %v1778_v2, %v580_v50  ;;  %v582_v62 = vmul.f32 %v1776_v1, %v293_v45  ;;  %v583_v63 = vmul.f32 %v1776_v1, %v294_v46  ;;  %v315_v45 = vld [vmem:[%s1769_s13 + $0x330] sm:$0xff]  ;;  %v316_v50 = vld [vmem:[%s1769_s13 + $0x338] sm:$0xff] }
  0x7f   : > { %1153 = vst [vmem:[%s1808_s24 + $0x250] sm:$0xff] %v865_v54  ;;  %1154 = vst [vmem:[%s1808_s24 + $0x258] sm:$0xff] %v866_v55  ;;  %v870_v3 = vadd.f32 %v1778_v2, %v581_v57  ;;  %v584_v4 = vmul.f32 %v1776_v1, %v295_v51  ;;  %v585_v5 = vmul.f32 %v1776_v1, %v296_v52  ;;  %v317_v55 = vld [vmem:[%s1769_s13 + $0x340] sm:$0xff] }
  0x80   : > { %1155 = vst [vmem:[%s1808_s24 + $0x260] sm:$0xff] %v867_v56  ;;  %v586_v6 = vmul.f32 %v1776_v1, %v297_v53  ;;  %1156 = vst [vmem:[%s1808_s24 + $0x268] sm:$0xff] %v868_v60  ;;  %v871_v9 = vadd.f32 %v1778_v2, %v582_v62  ;;  %v872_v10 = vadd.f32 %v1778_v2, %v583_v63  ;;  %v318_v56 = vld [vmem:[%s1769_s13 + $0x348] sm:$0xff]  ;;  %v320_v62 = vld [vmem:[%s1769_s13 + $0x358] sm:$0xff] }
  0x81   : > { %1157 = vst [vmem:[%s1808_s24 + $0x270] sm:$0xff] %v869_v61  ;;  %v587_v11 = vmul.f32 %v1776_v1, %v298_v58  ;;  %v588_v12 = vmul.f32 %v1776_v1, %v299_v59  ;;  %1158 = vst [vmem:[%s1808_s24 + $0x278] sm:$0xff] %v870_v3  ;;  %v873_v16 = vadd.f32 %v1778_v2, %v584_v4  ;;  %v319_v61 = vld [vmem:[%s1769_s13 + $0x350] sm:$0xff]  ;;  %v321_v63 = vld [vmem:[%s1769_s13 + $0x360] sm:$0xff] }
  0x82   : > { %v874_v17 = vadd.f32 %v1778_v2, %v585_v5  ;;  %v875_v18 = vadd.f32 %v1778_v2, %v586_v6  ;;  %v589_v19 = vmul.f32 %v1776_v1, %v300_v0  ;;  %1159 = vst [vmem:[%s1808_s24 + $0x280] sm:$0xff] %v871_v9  ;;  %1160 = vst [vmem:[%s1808_s24 + $0x288] sm:$0xff] %v872_v10  ;;  %v322_v6 = vld [vmem:[%s1769_s13 + $0x368] sm:$0xff] }
  0x83   : > { %v876_v22 = vadd.f32 %v1778_v2, %v587_v11  ;;  %v877_v23 = vadd.f32 %v1778_v2, %v588_v12  ;;  %v590_v24 = vmul.f32 %v1776_v1, %v301_v7  ;;  %v591_v25 = vmul.f32 %v1776_v1, %v302_v8  ;;  %1161 = vst [vmem:[%s1808_s24 + $0x290] sm:$0xff] %v873_v16  ;;  %v323_v7 = vld [vmem:[%s1769_s13 + $0x370] sm:$0xff]  ;;  %v324_v12 = vld [vmem:[%s1769_s13 + $0x378] sm:$0xff] }
  0x84   : > { %1162 = vst [vmem:[%s1808_s24 + $0x298] sm:$0xff] %v874_v17  ;;  %1163 = vst [vmem:[%s1808_s24 + $0x2a0] sm:$0xff] %v875_v18  ;;  %v878_v27 = vadd.f32 %v1778_v2, %v589_v19  ;;  %v592_v28 = vmul.f32 %v1776_v1, %v303_v13  ;;  %v593_v29 = vmul.f32 %v1776_v1, %v304_v14  ;;  %v325_v17 = vld [vmem:[%s1769_s13 + $0x380] sm:$0xff]  ;;  %v326_v18 = vld [vmem:[%s1769_s13 + $0x388] sm:$0xff] }
  0x85   : > { %v594_v30 = vmul.f32 %v1776_v1, %v305_v15  ;;  %1164 = vst [vmem:[%s1808_s24 + $0x2a8] sm:$0xff] %v876_v22  ;;  %1165 = vst [vmem:[%s1808_s24 + $0x2b0] sm:$0xff] %v877_v23  ;;  %v879_v33 = vadd.f32 %v1778_v2, %v590_v24  ;;  %v880_v34 = vadd.f32 %v1778_v2, %v591_v25  ;;  %v327_v23 = vld [vmem:[%s1769_s13 + $0x390] sm:$0xff]  ;;  %v328_v24 = vld [vmem:[%s1769_s13 + $0x398] sm:$0xff] }
  0x86   : > { %v595_v35 = vmul.f32 %v1776_v1, %v306_v20  ;;  %v596_v36 = vmul.f32 %v1776_v1, %v307_v21  ;;  %1166 = vst [vmem:[%s1808_s24 + $0x2b8] sm:$0xff] %v878_v27  ;;  %v881_v40 = vadd.f32 %v1778_v2, %v592_v28  ;;  %v882_v41 = vadd.f32 %v1778_v2, %v593_v29  ;;  %v329_v25 = vld [vmem:[%s1769_s13 + $0x3a0] sm:$0xff] }
  0x87   : > { %v883_v42 = vadd.f32 %v1778_v2, %v594_v30  ;;  %v597_v43 = vmul.f32 %v1776_v1, %v308_v26  ;;  %1167 = vst [vmem:[%s1808_s24 + $0x2c0] sm:$0xff] %v879_v33  ;;  %1168 = vst [vmem:[%s1808_s24 + $0x2c8] sm:$0xff] %v880_v34  ;;  %v598_v48 = vmul.f32 %v1776_v1, %v309_v31  ;;  %v330_v30 = vld [vmem:[%s1769_s13 + $0x3a8] sm:$0xff]  ;;  %v331_v31 = vld [vmem:[%s1769_s13 + $0x3b0] sm:$0xff] }
  0x88   : > { %v884_v46 = vadd.f32 %v1778_v2, %v595_v35  ;;  %v885_v47 = vadd.f32 %v1778_v2, %v596_v36  ;;  %v599_v49 = vmul.f32 %v1776_v1, %v310_v32  ;;  %1169 = vst [vmem:[%s1808_s24 + $0x2d0] sm:$0xff] %v881_v40  ;;  %1170 = vst [vmem:[%s1808_s24 + $0x2d8] sm:$0xff] %v882_v41  ;;  %v332_v36 = vld [vmem:[%s1769_s13 + $0x3b8] sm:$0xff]  ;;  %v333_v41 = vld [vmem:[%s1769_s13 + $0x3c0] sm:$0xff] }
  0x89   : > { %1171 = vst [vmem:[%s1808_s24 + $0x2e0] sm:$0xff] %v883_v42  ;;  %v886_v51 = vadd.f32 %v1778_v2, %v597_v43  ;;  %v600_v52 = vmul.f32 %v1776_v1, %v311_v37  ;;  %v601_v53 = vmul.f32 %v1776_v1, %v312_v38  ;;  %v602_v54 = vmul.f32 %v1776_v1, %v313_v39  ;;  %v334_v42 = vld [vmem:[%s1769_s13 + $0x3c8] sm:$0xff] }
  0x8a   : > { %1172 = vst [vmem:[%s1808_s24 + $0x2e8] sm:$0xff] %v884_v46  ;;  %1173 = vst [vmem:[%s1808_s24 + $0x2f0] sm:$0xff] %v885_v47  ;;  %v887_v57 = vadd.f32 %v1778_v2, %v598_v48  ;;  %v888_v58 = vadd.f32 %v1778_v2, %v599_v49  ;;  %v603_v59 = vmul.f32 %v1776_v1, %v314_v44  ;;  %v335_v47 = vld [vmem:[%s1769_s13 + $0x3d0] sm:$0xff]  ;;  %v336_v48 = vld [vmem:[%s1769_s13 + $0x3d8] sm:$0xff] }
  0x8b   : > { %v604_v60 = vmul.f32 %v1776_v1, %v315_v45  ;;  %1174 = vst [vmem:[%s1808_s24 + $0x2f8] sm:$0xff] %v886_v51  ;;  %v889_v0 = vadd.f32 %v1778_v2, %v600_v52  ;;  %v890_v3 = vadd.f32 %v1778_v2, %v601_v53  ;;  %v891_v4 = vadd.f32 %v1778_v2, %v602_v54  ;;  %v337_v49 = vld [vmem:[%s1769_s13 + $0x3e0] sm:$0xff]  ;;  %v338_v54 = vld [vmem:[%s1769_s13 + $0x3e8] sm:$0xff] }
  0x8c   : > { %v605_v5 = vmul.f32 %v1776_v1, %v316_v50  ;;  %1175 = vst [vmem:[%s1808_s24 + $0x300] sm:$0xff] %v887_v57  ;;  %1176 = vst [vmem:[%s1808_s24 + $0x308] sm:$0xff] %v888_v58  ;;  %v892_v8 = vadd.f32 %v1778_v2, %v603_v59  ;;  %v606_v10 = vmul.f32 %v1776_v1, %v317_v55  ;;  %v339_v55 = vld [vmem:[%s1769_s13 + $0x3f0] sm:$0xff] }
  0x8d   : > { %v893_v9 = vadd.f32 %v1778_v2, %v604_v60  ;;  %v607_v11 = vmul.f32 %v1776_v1, %v318_v56  ;;  %1177 = vst [vmem:[%s1808_s24 + $0x310] sm:$0xff] %v889_v0  ;;  %1178 = vst [vmem:[%s1808_s24 + $0x318] sm:$0xff] %v890_v3  ;;  %v608_v14 = vmul.f32 %v1776_v1, %v319_v61  ;;  %v340_v60 = vld [vmem:[%s1769_s13 + $0x3f8] sm:$0xff]  ;;  %v341_v3 = vld [vmem:[%s1769_s13 + $0x400] sm:$0xff] }
  0x8e   : > { %1179 = vst [vmem:[%s1808_s24 + $0x320] sm:$0xff] %v891_v4  ;;  %v894_v13 = vadd.f32 %v1778_v2, %v605_v5  ;;  %v609_v15 = vmul.f32 %v1776_v1, %v320_v62  ;;  %v610_v16 = vmul.f32 %v1776_v1, %v321_v63  ;;  %1180 = vst [vmem:[%s1808_s24 + $0x328] sm:$0xff] %v892_v8  ;;  %v342_v4 = vld [vmem:[%s1769_s13 + $0x408] sm:$0xff] }
  0x8f   : > { %1181 = vst [vmem:[%s1808_s24 + $0x330] sm:$0xff] %v893_v9  ;;  %v895_v19 = vadd.f32 %v1778_v2, %v606_v10  ;;  %v896_v20 = vadd.f32 %v1778_v2, %v607_v11  ;;  %v611_v21 = vmul.f32 %v1776_v1, %v322_v6  ;;  %v612_v22 = vmul.f32 %v1776_v1, %v323_v7  ;;  %v343_v9 = vld [vmem:[%s1769_s13 + $0x410] sm:$0xff]  ;;  %v344_v10 = vld [vmem:[%s1769_s13 + $0x418] sm:$0xff]  ;;  %v345_v11 = vld [vmem:[%s1769_s13 + $0x420] sm:$0xff] }
  0x90   : > { %1182 = vst [vmem:[%s1808_s24 + $0x338] sm:$0xff] %v894_v13  ;;  %v897_v26 = vadd.f32 %v1778_v2, %v608_v14  ;;  %v898_v27 = vadd.f32 %v1778_v2, %v609_v15  ;;  %v899_v28 = vadd.f32 %v1778_v2, %v610_v16  ;;  %v613_v29 = vmul.f32 %v1776_v1, %v324_v12  ;;  %v346_v16 = vld [vmem:[%s1769_s13 + $0x428] sm:$0xff] }
  0x91   : > { %1183 = vst [vmem:[%s1808_s24 + $0x340] sm:$0xff] %v895_v19  ;;  %1184 = vst [vmem:[%s1808_s24 + $0x348] sm:$0xff] %v896_v20  ;;  %v900_v32 = vadd.f32 %v1778_v2, %v611_v21  ;;  %v901_v33 = vadd.f32 %v1778_v2, %v612_v22  ;;  %v614_v34 = vmul.f32 %v1776_v1, %v325_v17  ;;  %v347_v17 = vld [vmem:[%s1769_s13 + $0x430] sm:$0xff]  ;;  %v348_v22 = vld [vmem:[%s1769_s13 + $0x438] sm:$0xff] }
  0x92   : > { %v615_v35 = vmul.f32 %v1776_v1, %v326_v18  ;;  %1185 = vst [vmem:[%s1808_s24 + $0x350] sm:$0xff] %v897_v26  ;;  %1186 = vst [vmem:[%s1808_s24 + $0x358] sm:$0xff] %v898_v27  ;;  %v902_v37 = vadd.f32 %v1778_v2, %v613_v29  ;;  %v616_v38 = vmul.f32 %v1776_v1, %v327_v23  ;;  %v349_v27 = vld [vmem:[%s1769_s13 + $0x440] sm:$0xff] }
  0x93   : > { %1187 = vst [vmem:[%s1808_s24 + $0x360] sm:$0xff] %v899_v28  ;;  %v617_v39 = vmul.f32 %v1776_v1, %v328_v24  ;;  %v618_v40 = vmul.f32 %v1776_v1, %v329_v25  ;;  %1188 = vst [vmem:[%s1808_s24 + $0x368] sm:$0xff] %v900_v32  ;;  %v903_v43 = vadd.f32 %v1778_v2, %v614_v34  ;;  %v350_v28 = vld [vmem:[%s1769_s13 + $0x448] sm:$0xff]  ;;  %v352_v34 = vld [vmem:[%s1769_s13 + $0x458] sm:$0xff] }
  0x94   : > { %1189 = vst [vmem:[%s1808_s24 + $0x370] sm:$0xff] %v901_v33  ;;  %v904_v44 = vadd.f32 %v1778_v2, %v615_v35  ;;  %v619_v45 = vmul.f32 %v1776_v1, %v330_v30  ;;  %v620_v46 = vmul.f32 %v1776_v1, %v331_v31  ;;  %1190 = vst [vmem:[%s1808_s24 + $0x378] sm:$0xff] %v902_v37  ;;  %v351_v33 = vld [vmem:[%s1769_s13 + $0x450] sm:$0xff]  ;;  %v353_v35 = vld [vmem:[%s1769_s13 + $0x460] sm:$0xff] }
  0x95   : > { %v905_v50 = vadd.f32 %v1778_v2, %v616_v38  ;;  %v906_v51 = vadd.f32 %v1778_v2, %v617_v39  ;;  %v907_v52 = vadd.f32 %v1778_v2, %v618_v40  ;;  %v621_v53 = vmul.f32 %v1776_v1, %v332_v36  ;;  %1191 = vst [vmem:[%s1808_s24 + $0x380] sm:$0xff] %v903_v43  ;;  %v354_v40 = vld [vmem:[%s1769_s13 + $0x468] sm:$0xff] }
  0x96   : > { %1192 = vst [vmem:[%s1808_s24 + $0x388] sm:$0xff] %v904_v44  ;;  %v908_v56 = vadd.f32 %v1778_v2, %v619_v45  ;;  %v909_v57 = vadd.f32 %v1778_v2, %v620_v46  ;;  %v622_v58 = vmul.f32 %v1776_v1, %v333_v41  ;;  %v623_v59 = vmul.f32 %v1776_v1, %v334_v42  ;;  %v355_v41 = vld [vmem:[%s1769_s13 + $0x470] sm:$0xff]  ;;  %v356_v46 = vld [vmem:[%s1769_s13 + $0x478] sm:$0xff] }
  0x97   : > { %1193 = vst [vmem:[%s1808_s24 + $0x390] sm:$0xff] %v905_v50  ;;  %1194 = vst [vmem:[%s1808_s24 + $0x398] sm:$0xff] %v906_v51  ;;  %v910_v61 = vadd.f32 %v1778_v2, %v621_v53  ;;  %v624_v62 = vmul.f32 %v1776_v1, %v335_v47  ;;  %v625_v63 = vmul.f32 %v1776_v1, %v336_v48  ;;  %v357_v51 = vld [vmem:[%s1769_s13 + $0x480] sm:$0xff] }
  0x98   : > { %1195 = vst [vmem:[%s1808_s24 + $0x3a0] sm:$0xff] %v907_v52  ;;  %v626_v0 = vmul.f32 %v1776_v1, %v337_v49  ;;  %1196 = vst [vmem:[%s1808_s24 + $0x3a8] sm:$0xff] %v908_v56  ;;  %v911_v5 = vadd.f32 %v1778_v2, %v622_v58  ;;  %v912_v6 = vadd.f32 %v1778_v2, %v623_v59  ;;  %v358_v52 = vld [vmem:[%s1769_s13 + $0x488] sm:$0xff]  ;;  %v360_v58 = vld [vmem:[%s1769_s13 + $0x498] sm:$0xff] }
  0x99   : > { %1197 = vst [vmem:[%s1808_s24 + $0x3b0] sm:$0xff] %v909_v57  ;;  %v627_v7 = vmul.f32 %v1776_v1, %v338_v54  ;;  %v628_v8 = vmul.f32 %v1776_v1, %v339_v55  ;;  %1198 = vst [vmem:[%s1808_s24 + $0x3b8] sm:$0xff] %v910_v61  ;;  %v913_v12 = vadd.f32 %v1778_v2, %v624_v62  ;;  %v359_v57 = vld [vmem:[%s1769_s13 + $0x490] sm:$0xff]  ;;  %v361_v59 = vld [vmem:[%s1769_s13 + $0x4a0] sm:$0xff] }
  0x9a   : > { %v914_v13 = vadd.f32 %v1778_v2, %v625_v63  ;;  %v915_v14 = vadd.f32 %v1778_v2, %v626_v0  ;;  %v629_v15 = vmul.f32 %v1776_v1, %v340_v60  ;;  %1199 = vst [vmem:[%s1808_s24 + $0x3c0] sm:$0xff] %v911_v5  ;;  %1200 = vst [vmem:[%s1808_s24 + $0x3c8] sm:$0xff] %v912_v6  ;;  %v362_v0 = vld [vmem:[%s1769_s13 + $0x4a8] sm:$0xff] }
  0x9b   : > { %v916_v18 = vadd.f32 %v1778_v2, %v627_v7  ;;  %v917_v19 = vadd.f32 %v1778_v2, %v628_v8  ;;  %v630_v20 = vmul.f32 %v1776_v1, %v341_v3  ;;  %v631_v21 = vmul.f32 %v1776_v1, %v342_v4  ;;  %1201 = vst [vmem:[%s1808_s24 + $0x3d0] sm:$0xff] %v913_v12  ;;  %v363_v3 = vld [vmem:[%s1769_s13 + $0x4b0] sm:$0xff]  ;;  %v364_v8 = vld [vmem:[%s1769_s13 + $0x4b8] sm:$0xff] }
  0x9c   : > { %1202 = vst [vmem:[%s1808_s24 + $0x3d8] sm:$0xff] %v914_v13  ;;  %1203 = vst [vmem:[%s1808_s24 + $0x3e0] sm:$0xff] %v915_v14  ;;  %v918_v23 = vadd.f32 %v1778_v2, %v629_v15  ;;  %v632_v24 = vmul.f32 %v1776_v1, %v343_v9  ;;  %v633_v25 = vmul.f32 %v1776_v1, %v344_v10  ;;  %v365_v13 = vld [vmem:[%s1769_s13 + $0x4c0] sm:$0xff]  ;;  %v366_v14 = vld [vmem:[%s1769_s13 + $0x4c8] sm:$0xff] }
  0x9d   : > { %v634_v26 = vmul.f32 %v1776_v1, %v345_v11  ;;  %1204 = vst [vmem:[%s1808_s24 + $0x3e8] sm:$0xff] %v916_v18  ;;  %1205 = vst [vmem:[%s1808_s24 + $0x3f0] sm:$0xff] %v917_v19  ;;  %v919_v29 = vadd.f32 %v1778_v2, %v630_v20  ;;  %v920_v30 = vadd.f32 %v1778_v2, %v631_v21  ;;  %v367_v19 = vld [vmem:[%s1769_s13 + $0x4d0] sm:$0xff]  ;;  %v368_v20 = vld [vmem:[%s1769_s13 + $0x4d8] sm:$0xff] }
  0x9e   : > { %v635_v31 = vmul.f32 %v1776_v1, %v346_v16  ;;  %v636_v32 = vmul.f32 %v1776_v1, %v347_v17  ;;  %1206 = vst [vmem:[%s1808_s24 + $0x3f8] sm:$0xff] %v918_v23  ;;  %v921_v36 = vadd.f32 %v1778_v2, %v632_v24  ;;  %v922_v37 = vadd.f32 %v1778_v2, %v633_v25  ;;  %v369_v21 = vld [vmem:[%s1769_s13 + $0x4e0] sm:$0xff] }
  0x9f   : > { %v923_v38 = vadd.f32 %v1778_v2, %v634_v26  ;;  %v637_v39 = vmul.f32 %v1776_v1, %v348_v22  ;;  %1207 = vst [vmem:[%s1808_s24 + $0x400] sm:$0xff] %v919_v29  ;;  %1208 = vst [vmem:[%s1808_s24 + $0x408] sm:$0xff] %v920_v30  ;;  %v638_v44 = vmul.f32 %v1776_v1, %v349_v27  ;;  %v370_v26 = vld [vmem:[%s1769_s13 + $0x4e8] sm:$0xff]  ;;  %v371_v27 = vld [vmem:[%s1769_s13 + $0x4f0] sm:$0xff] }
  0xa0   : > { %v924_v42 = vadd.f32 %v1778_v2, %v635_v31  ;;  %v925_v43 = vadd.f32 %v1778_v2, %v636_v32  ;;  %v639_v45 = vmul.f32 %v1776_v1, %v350_v28  ;;  %1209 = vst [vmem:[%s1808_s24 + $0x410] sm:$0xff] %v921_v36  ;;  %1210 = vst [vmem:[%s1808_s24 + $0x418] sm:$0xff] %v922_v37  ;;  %v372_v32 = vld [vmem:[%s1769_s13 + $0x4f8] sm:$0xff]  ;;  %v373_v37 = vld [vmem:[%s1769_s13 + $0x500] sm:$0xff] }
  0xa1   : > { %1211 = vst [vmem:[%s1808_s24 + $0x420] sm:$0xff] %v923_v38  ;;  %v926_v47 = vadd.f32 %v1778_v2, %v637_v39  ;;  %v640_v48 = vmul.f32 %v1776_v1, %v351_v33  ;;  %v641_v49 = vmul.f32 %v1776_v1, %v352_v34  ;;  %v642_v50 = vmul.f32 %v1776_v1, %v353_v35  ;;  %v374_v38 = vld [vmem:[%s1769_s13 + $0x508] sm:$0xff] }
  0xa2   : > { %1212 = vst [vmem:[%s1808_s24 + $0x428] sm:$0xff] %v924_v42  ;;  %1213 = vst [vmem:[%s1808_s24 + $0x430] sm:$0xff] %v925_v43  ;;  %v927_v53 = vadd.f32 %v1778_v2, %v638_v44  ;;  %v928_v54 = vadd.f32 %v1778_v2, %v639_v45  ;;  %v643_v55 = vmul.f32 %v1776_v1, %v354_v40  ;;  %v375_v43 = vld [vmem:[%s1769_s13 + $0x510] sm:$0xff]  ;;  %v376_v44 = vld [vmem:[%s1769_s13 + $0x518] sm:$0xff] }
  0xa3   : > { %v644_v56 = vmul.f32 %v1776_v1, %v355_v41  ;;  %1214 = vst [vmem:[%s1808_s24 + $0x438] sm:$0xff] %v926_v47  ;;  %v929_v60 = vadd.f32 %v1778_v2, %v640_v48  ;;  %v930_v61 = vadd.f32 %v1778_v2, %v641_v49  ;;  %v931_v62 = vadd.f32 %v1778_v2, %v642_v50  ;;  %v377_v45 = vld [vmem:[%s1769_s13 + $0x520] sm:$0xff]  ;;  %v378_v50 = vld [vmem:[%s1769_s13 + $0x528] sm:$0xff] }
  0xa4   : > { %v645_v63 = vmul.f32 %v1776_v1, %v356_v46  ;;  %1215 = vst [vmem:[%s1808_s24 + $0x440] sm:$0xff] %v927_v53  ;;  %1216 = vst [vmem:[%s1808_s24 + $0x448] sm:$0xff] %v928_v54  ;;  %v932_v4 = vadd.f32 %v1778_v2, %v643_v55  ;;  %v646_v6 = vmul.f32 %v1776_v1, %v357_v51  ;;  %v379_v51 = vld [vmem:[%s1769_s13 + $0x530] sm:$0xff] }
  0xa5   : > { %v933_v5 = vadd.f32 %v1778_v2, %v644_v56  ;;  %v647_v7 = vmul.f32 %v1776_v1, %v358_v52  ;;  %1217 = vst [vmem:[%s1808_s24 + $0x450] sm:$0xff] %v929_v60  ;;  %1218 = vst [vmem:[%s1808_s24 + $0x458] sm:$0xff] %v930_v61  ;;  %v648_v10 = vmul.f32 %v1776_v1, %v359_v57  ;;  %v380_v56 = vld [vmem:[%s1769_s13 + $0x538] sm:$0xff]  ;;  %v381_v61 = vld [vmem:[%s1769_s13 + $0x540] sm:$0xff] }
  0xa6   : > { %1219 = vst [vmem:[%s1808_s24 + $0x460] sm:$0xff] %v931_v62  ;;  %v934_v9 = vadd.f32 %v1778_v2, %v645_v63  ;;  %v649_v11 = vmul.f32 %v1776_v1, %v360_v58  ;;  %v650_v12 = vmul.f32 %v1776_v1, %v361_v59  ;;  %1220 = vst [vmem:[%s1808_s24 + $0x468] sm:$0xff] %v932_v4  ;;  %v382_v62 = vld [vmem:[%s1769_s13 + $0x548] sm:$0xff] }
  0xa7   : > { %1221 = vst [vmem:[%s1808_s24 + $0x470] sm:$0xff] %v933_v5  ;;  %v935_v15 = vadd.f32 %v1778_v2, %v646_v6  ;;  %v936_v16 = vadd.f32 %v1778_v2, %v647_v7  ;;  %v651_v17 = vmul.f32 %v1776_v1, %v362_v0  ;;  %v652_v18 = vmul.f32 %v1776_v1, %v363_v3  ;;  %v383_v5 = vld [vmem:[%s1769_s13 + $0x550] sm:$0xff]  ;;  %v384_v6 = vld [vmem:[%s1769_s13 + $0x558] sm:$0xff]  ;;  %v385_v7 = vld [vmem:[%s1769_s13 + $0x560] sm:$0xff] }
  0xa8   : > { %1222 = vst [vmem:[%s1808_s24 + $0x478] sm:$0xff] %v934_v9  ;;  %v937_v22 = vadd.f32 %v1778_v2, %v648_v10  ;;  %v938_v23 = vadd.f32 %v1778_v2, %v649_v11  ;;  %v939_v24 = vadd.f32 %v1778_v2, %v650_v12  ;;  %v653_v25 = vmul.f32 %v1776_v1, %v364_v8  ;;  %v386_v12 = vld [vmem:[%s1769_s13 + $0x568] sm:$0xff] }
  0xa9   : > { %1223 = vst [vmem:[%s1808_s24 + $0x480] sm:$0xff] %v935_v15  ;;  %1224 = vst [vmem:[%s1808_s24 + $0x488] sm:$0xff] %v936_v16  ;;  %v940_v28 = vadd.f32 %v1778_v2, %v651_v17  ;;  %v941_v29 = vadd.f32 %v1778_v2, %v652_v18  ;;  %v654_v30 = vmul.f32 %v1776_v1, %v365_v13  ;;  %v387_v13 = vld [vmem:[%s1769_s13 + $0x570] sm:$0xff]  ;;  %v388_v18 = vld [vmem:[%s1769_s13 + $0x578] sm:$0xff] }
  0xaa   : > { %v655_v31 = vmul.f32 %v1776_v1, %v366_v14  ;;  %1225 = vst [vmem:[%s1808_s24 + $0x490] sm:$0xff] %v937_v22  ;;  %1226 = vst [vmem:[%s1808_s24 + $0x498] sm:$0xff] %v938_v23  ;;  %v942_v33 = vadd.f32 %v1778_v2, %v653_v25  ;;  %v656_v34 = vmul.f32 %v1776_v1, %v367_v19  ;;  %v389_v23 = vld [vmem:[%s1769_s13 + $0x580] sm:$0xff] }
  0xab   : > { %1227 = vst [vmem:[%s1808_s24 + $0x4a0] sm:$0xff] %v939_v24  ;;  %v657_v35 = vmul.f32 %v1776_v1, %v368_v20  ;;  %v658_v36 = vmul.f32 %v1776_v1, %v369_v21  ;;  %1228 = vst [vmem:[%s1808_s24 + $0x4a8] sm:$0xff] %v940_v28  ;;  %v943_v39 = vadd.f32 %v1778_v2, %v654_v30  ;;  %v390_v24 = vld [vmem:[%s1769_s13 + $0x588] sm:$0xff]  ;;  %v392_v30 = vld [vmem:[%s1769_s13 + $0x598] sm:$0xff] }
  0xac   : > { %1229 = vst [vmem:[%s1808_s24 + $0x4b0] sm:$0xff] %v941_v29  ;;  %v944_v40 = vadd.f32 %v1778_v2, %v655_v31  ;;  %v659_v41 = vmul.f32 %v1776_v1, %v370_v26  ;;  %v660_v42 = vmul.f32 %v1776_v1, %v371_v27  ;;  %1230 = vst [vmem:[%s1808_s24 + $0x4b8] sm:$0xff] %v942_v33  ;;  %v391_v29 = vld [vmem:[%s1769_s13 + $0x590] sm:$0xff]  ;;  %v393_v31 = vld [vmem:[%s1769_s13 + $0x5a0] sm:$0xff] }
  0xad   : > { %v945_v46 = vadd.f32 %v1778_v2, %v656_v34  ;;  %v946_v47 = vadd.f32 %v1778_v2, %v657_v35  ;;  %v947_v48 = vadd.f32 %v1778_v2, %v658_v36  ;;  %v661_v49 = vmul.f32 %v1776_v1, %v372_v32  ;;  %1231 = vst [vmem:[%s1808_s24 + $0x4c0] sm:$0xff] %v943_v39  ;;  %v394_v36 = vld [vmem:[%s1769_s13 + $0x5a8] sm:$0xff] }
  0xae   : > { %1232 = vst [vmem:[%s1808_s24 + $0x4c8] sm:$0xff] %v944_v40  ;;  %v948_v52 = vadd.f32 %v1778_v2, %v659_v41  ;;  %v949_v53 = vadd.f32 %v1778_v2, %v660_v42  ;;  %v662_v54 = vmul.f32 %v1776_v1, %v373_v37  ;;  %v663_v55 = vmul.f32 %v1776_v1, %v374_v38  ;;  %v395_v37 = vld [vmem:[%s1769_s13 + $0x5b0] sm:$0xff]  ;;  %v396_v42 = vld [vmem:[%s1769_s13 + $0x5b8] sm:$0xff] }
  0xaf   : > { %1233 = vst [vmem:[%s1808_s24 + $0x4d0] sm:$0xff] %v945_v46  ;;  %1234 = vst [vmem:[%s1808_s24 + $0x4d8] sm:$0xff] %v946_v47  ;;  %v950_v57 = vadd.f32 %v1778_v2, %v661_v49  ;;  %v664_v58 = vmul.f32 %v1776_v1, %v375_v43  ;;  %v665_v59 = vmul.f32 %v1776_v1, %v376_v44  ;;  %v397_v47 = vld [vmem:[%s1769_s13 + $0x5c0] sm:$0xff] }
  0xb0   : > { %1235 = vst [vmem:[%s1808_s24 + $0x4e0] sm:$0xff] %v947_v48  ;;  %v666_v60 = vmul.f32 %v1776_v1, %v377_v45  ;;  %1236 = vst [vmem:[%s1808_s24 + $0x4e8] sm:$0xff] %v948_v52  ;;  %v951_v63 = vadd.f32 %v1778_v2, %v662_v54  ;;  %v952_v0 = vadd.f32 %v1778_v2, %v663_v55  ;;  %v398_v48 = vld [vmem:[%s1769_s13 + $0x5c8] sm:$0xff]  ;;  %v400_v54 = vld [vmem:[%s1769_s13 + $0x5d8] sm:$0xff] }
  0xb1   : > { %1237 = vst [vmem:[%s1808_s24 + $0x4f0] sm:$0xff] %v949_v53  ;;  %v667_v3 = vmul.f32 %v1776_v1, %v378_v50  ;;  %v668_v4 = vmul.f32 %v1776_v1, %v379_v51  ;;  %1238 = vst [vmem:[%s1808_s24 + $0x4f8] sm:$0xff] %v950_v57  ;;  %v953_v8 = vadd.f32 %v1778_v2, %v664_v58  ;;  %v399_v53 = vld [vmem:[%s1769_s13 + $0x5d0] sm:$0xff]  ;;  %v401_v55 = vld [vmem:[%s1769_s13 + $0x5e0] sm:$0xff] }
  0xb2   : > { %v954_v9 = vadd.f32 %v1778_v2, %v665_v59  ;;  %v955_v10 = vadd.f32 %v1778_v2, %v666_v60  ;;  %v669_v11 = vmul.f32 %v1776_v1, %v380_v56  ;;  %1239 = vst [vmem:[%s1808_s24 + $0x500] sm:$0xff] %v951_v63  ;;  %1240 = vst [vmem:[%s1808_s24 + $0x508] sm:$0xff] %v952_v0  ;;  %v402_v60 = vld [vmem:[%s1769_s13 + $0x5e8] sm:$0xff] }
  0xb3   : > { %v956_v14 = vadd.f32 %v1778_v2, %v667_v3  ;;  %v957_v15 = vadd.f32 %v1778_v2, %v668_v4  ;;  %v670_v16 = vmul.f32 %v1776_v1, %v381_v61  ;;  %v671_v17 = vmul.f32 %v1776_v1, %v382_v62  ;;  %1241 = vst [vmem:[%s1808_s24 + $0x510] sm:$0xff] %v953_v8  ;;  %v403_v61 = vld [vmem:[%s1769_s13 + $0x5f0] sm:$0xff]  ;;  %v404_v4 = vld [vmem:[%s1769_s13 + $0x5f8] sm:$0xff] }
  0xb4   : > { %1242 = vst [vmem:[%s1808_s24 + $0x518] sm:$0xff] %v954_v9  ;;  %1243 = vst [vmem:[%s1808_s24 + $0x520] sm:$0xff] %v955_v10  ;;  %v958_v19 = vadd.f32 %v1778_v2, %v669_v11  ;;  %v672_v20 = vmul.f32 %v1776_v1, %v383_v5  ;;  %v673_v21 = vmul.f32 %v1776_v1, %v384_v6  ;;  %v405_v9 = vld [vmem:[%s1769_s13 + $0x600] sm:$0xff]  ;;  %v406_v10 = vld [vmem:[%s1769_s13 + $0x608] sm:$0xff] }
  0xb5   : > { %v674_v22 = vmul.f32 %v1776_v1, %v385_v7  ;;  %1244 = vst [vmem:[%s1808_s24 + $0x528] sm:$0xff] %v956_v14  ;;  %1245 = vst [vmem:[%s1808_s24 + $0x530] sm:$0xff] %v957_v15  ;;  %v959_v25 = vadd.f32 %v1778_v2, %v670_v16  ;;  %v960_v26 = vadd.f32 %v1778_v2, %v671_v17  ;;  %v407_v15 = vld [vmem:[%s1769_s13 + $0x610] sm:$0xff]  ;;  %v408_v16 = vld [vmem:[%s1769_s13 + $0x618] sm:$0xff] }
  0xb6   : > { %v675_v27 = vmul.f32 %v1776_v1, %v386_v12  ;;  %v676_v28 = vmul.f32 %v1776_v1, %v387_v13  ;;  %1246 = vst [vmem:[%s1808_s24 + $0x538] sm:$0xff] %v958_v19  ;;  %v961_v32 = vadd.f32 %v1778_v2, %v672_v20  ;;  %v962_v33 = vadd.f32 %v1778_v2, %v673_v21  ;;  %v409_v17 = vld [vmem:[%s1769_s13 + $0x620] sm:$0xff] }
  0xb7   : > { %v963_v34 = vadd.f32 %v1778_v2, %v674_v22  ;;  %v677_v35 = vmul.f32 %v1776_v1, %v388_v18  ;;  %1247 = vst [vmem:[%s1808_s24 + $0x540] sm:$0xff] %v959_v25  ;;  %1248 = vst [vmem:[%s1808_s24 + $0x548] sm:$0xff] %v960_v26  ;;  %v678_v40 = vmul.f32 %v1776_v1, %v389_v23  ;;  %v410_v22 = vld [vmem:[%s1769_s13 + $0x628] sm:$0xff]  ;;  %v411_v23 = vld [vmem:[%s1769_s13 + $0x630] sm:$0xff] }
  0xb8   : > { %v964_v38 = vadd.f32 %v1778_v2, %v675_v27  ;;  %v965_v39 = vadd.f32 %v1778_v2, %v676_v28  ;;  %v679_v41 = vmul.f32 %v1776_v1, %v390_v24  ;;  %1249 = vst [vmem:[%s1808_s24 + $0x550] sm:$0xff] %v961_v32  ;;  %1250 = vst [vmem:[%s1808_s24 + $0x558] sm:$0xff] %v962_v33  ;;  %v412_v28 = vld [vmem:[%s1769_s13 + $0x638] sm:$0xff]  ;;  %v413_v33 = vld [vmem:[%s1769_s13 + $0x640] sm:$0xff] }
  0xb9   : > { %1251 = vst [vmem:[%s1808_s24 + $0x560] sm:$0xff] %v963_v34  ;;  %v966_v43 = vadd.f32 %v1778_v2, %v677_v35  ;;  %v680_v44 = vmul.f32 %v1776_v1, %v391_v29  ;;  %v681_v45 = vmul.f32 %v1776_v1, %v392_v30  ;;  %v682_v46 = vmul.f32 %v1776_v1, %v393_v31  ;;  %v414_v34 = vld [vmem:[%s1769_s13 + $0x648] sm:$0xff] }
  0xba   : > { %1252 = vst [vmem:[%s1808_s24 + $0x568] sm:$0xff] %v964_v38  ;;  %1253 = vst [vmem:[%s1808_s24 + $0x570] sm:$0xff] %v965_v39  ;;  %v967_v49 = vadd.f32 %v1778_v2, %v678_v40  ;;  %v968_v50 = vadd.f32 %v1778_v2, %v679_v41  ;;  %v683_v51 = vmul.f32 %v1776_v1, %v394_v36  ;;  %v415_v39 = vld [vmem:[%s1769_s13 + $0x650] sm:$0xff]  ;;  %v416_v40 = vld [vmem:[%s1769_s13 + $0x658] sm:$0xff] }
  0xbb   : > { %v684_v52 = vmul.f32 %v1776_v1, %v395_v37  ;;  %1254 = vst [vmem:[%s1808_s24 + $0x578] sm:$0xff] %v966_v43  ;;  %v969_v56 = vadd.f32 %v1778_v2, %v680_v44  ;;  %v970_v57 = vadd.f32 %v1778_v2, %v681_v45  ;;  %v971_v58 = vadd.f32 %v1778_v2, %v682_v46  ;;  %v417_v41 = vld [vmem:[%s1769_s13 + $0x660] sm:$0xff]  ;;  %v418_v46 = vld [vmem:[%s1769_s13 + $0x668] sm:$0xff] }
  0xbc   : > { %v685_v59 = vmul.f32 %v1776_v1, %v396_v42  ;;  %1255 = vst [vmem:[%s1808_s24 + $0x580] sm:$0xff] %v967_v49  ;;  %1256 = vst [vmem:[%s1808_s24 + $0x588] sm:$0xff] %v968_v50  ;;  %v972_v62 = vadd.f32 %v1778_v2, %v683_v51  ;;  %v686_v0 = vmul.f32 %v1776_v1, %v397_v47  ;;  %v419_v47 = vld [vmem:[%s1769_s13 + $0x670] sm:$0xff] }
  0xbd   : > { %v973_v63 = vadd.f32 %v1778_v2, %v684_v52  ;;  %v687_v3 = vmul.f32 %v1776_v1, %v398_v48  ;;  %1257 = vst [vmem:[%s1808_s24 + $0x590] sm:$0xff] %v969_v56  ;;  %1258 = vst [vmem:[%s1808_s24 + $0x598] sm:$0xff] %v970_v57  ;;  %v688_v6 = vmul.f32 %v1776_v1, %v399_v53  ;;  %v420_v52 = vld [vmem:[%s1769_s13 + $0x678] sm:$0xff]  ;;  %v421_v57 = vld [vmem:[%s1769_s13 + $0x680] sm:$0xff] }
  0xbe   : > { %1259 = vst [vmem:[%s1808_s24 + $0x5a0] sm:$0xff] %v971_v58  ;;  %v974_v5 = vadd.f32 %v1778_v2, %v685_v59  ;;  %v689_v7 = vmul.f32 %v1776_v1, %v400_v54  ;;  %v690_v8 = vmul.f32 %v1776_v1, %v401_v55  ;;  %1260 = vst [vmem:[%s1808_s24 + $0x5a8] sm:$0xff] %v972_v62  ;;  %v422_v58 = vld [vmem:[%s1769_s13 + $0x688] sm:$0xff] }
  0xbf   : > { %1261 = vst [vmem:[%s1808_s24 + $0x5b0] sm:$0xff] %v973_v63  ;;  %v975_v11 = vadd.f32 %v1778_v2, %v686_v0  ;;  %v976_v12 = vadd.f32 %v1778_v2, %v687_v3  ;;  %v691_v13 = vmul.f32 %v1776_v1, %v402_v60  ;;  %v692_v14 = vmul.f32 %v1776_v1, %v403_v61  ;;  %v423_v63 = vld [vmem:[%s1769_s13 + $0x690] sm:$0xff]  ;;  %v424_v0 = vld [vmem:[%s1769_s13 + $0x698] sm:$0xff]  ;;  %v425_v3 = vld [vmem:[%s1769_s13 + $0x6a0] sm:$0xff] }
  0xc0   : > { %1262 = vst [vmem:[%s1808_s24 + $0x5b8] sm:$0xff] %v974_v5  ;;  %v977_v18 = vadd.f32 %v1778_v2, %v688_v6  ;;  %v978_v19 = vadd.f32 %v1778_v2, %v689_v7  ;;  %v979_v20 = vadd.f32 %v1778_v2, %v690_v8  ;;  %v693_v21 = vmul.f32 %v1776_v1, %v404_v4  ;;  %v426_v8 = vld [vmem:[%s1769_s13 + $0x6a8] sm:$0xff] }
  0xc1   : > { %1263 = vst [vmem:[%s1808_s24 + $0x5c0] sm:$0xff] %v975_v11  ;;  %1264 = vst [vmem:[%s1808_s24 + $0x5c8] sm:$0xff] %v976_v12  ;;  %v980_v24 = vadd.f32 %v1778_v2, %v691_v13  ;;  %v981_v25 = vadd.f32 %v1778_v2, %v692_v14  ;;  %v694_v26 = vmul.f32 %v1776_v1, %v405_v9  ;;  %v427_v9 = vld [vmem:[%s1769_s13 + $0x6b0] sm:$0xff]  ;;  %v428_v14 = vld [vmem:[%s1769_s13 + $0x6b8] sm:$0xff] }
  0xc2   : > { %v695_v27 = vmul.f32 %v1776_v1, %v406_v10  ;;  %1265 = vst [vmem:[%s1808_s24 + $0x5d0] sm:$0xff] %v977_v18  ;;  %1266 = vst [vmem:[%s1808_s24 + $0x5d8] sm:$0xff] %v978_v19  ;;  %v982_v29 = vadd.f32 %v1778_v2, %v693_v21  ;;  %v696_v30 = vmul.f32 %v1776_v1, %v407_v15  ;;  %v429_v19 = vld [vmem:[%s1769_s13 + $0x6c0] sm:$0xff] }
  0xc3   : > { %1267 = vst [vmem:[%s1808_s24 + $0x5e0] sm:$0xff] %v979_v20  ;;  %v697_v31 = vmul.f32 %v1776_v1, %v408_v16  ;;  %v698_v32 = vmul.f32 %v1776_v1, %v409_v17  ;;  %1268 = vst [vmem:[%s1808_s24 + $0x5e8] sm:$0xff] %v980_v24  ;;  %v983_v35 = vadd.f32 %v1778_v2, %v694_v26  ;;  %v430_v20 = vld [vmem:[%s1769_s13 + $0x6c8] sm:$0xff]  ;;  %v432_v26 = vld [vmem:[%s1769_s13 + $0x6d8] sm:$0xff] }
  0xc4   : > { %1269 = vst [vmem:[%s1808_s24 + $0x5f0] sm:$0xff] %v981_v25  ;;  %v984_v36 = vadd.f32 %v1778_v2, %v695_v27  ;;  %v699_v37 = vmul.f32 %v1776_v1, %v410_v22  ;;  %v700_v38 = vmul.f32 %v1776_v1, %v411_v23  ;;  %1270 = vst [vmem:[%s1808_s24 + $0x5f8] sm:$0xff] %v982_v29  ;;  %v431_v25 = vld [vmem:[%s1769_s13 + $0x6d0] sm:$0xff]  ;;  %v433_v27 = vld [vmem:[%s1769_s13 + $0x6e0] sm:$0xff] }
  0xc5   : > { %v985_v42 = vadd.f32 %v1778_v2, %v696_v30  ;;  %v986_v43 = vadd.f32 %v1778_v2, %v697_v31  ;;  %v987_v44 = vadd.f32 %v1778_v2, %v698_v32  ;;  %v701_v45 = vmul.f32 %v1776_v1, %v412_v28  ;;  %1271 = vst [vmem:[%s1808_s24 + $0x600] sm:$0xff] %v983_v35  ;;  %v434_v32 = vld [vmem:[%s1769_s13 + $0x6e8] sm:$0xff] }
  0xc6   : > { %1272 = vst [vmem:[%s1808_s24 + $0x608] sm:$0xff] %v984_v36  ;;  %v988_v48 = vadd.f32 %v1778_v2, %v699_v37  ;;  %v989_v49 = vadd.f32 %v1778_v2, %v700_v38  ;;  %v702_v50 = vmul.f32 %v1776_v1, %v413_v33  ;;  %v703_v51 = vmul.f32 %v1776_v1, %v414_v34  ;;  %v435_v33 = vld [vmem:[%s1769_s13 + $0x6f0] sm:$0xff]  ;;  %v436_v38 = vld [vmem:[%s1769_s13 + $0x6f8] sm:$0xff] }
  0xc7   : > { %1273 = vst [vmem:[%s1808_s24 + $0x610] sm:$0xff] %v985_v42  ;;  %1274 = vst [vmem:[%s1808_s24 + $0x618] sm:$0xff] %v986_v43  ;;  %v990_v53 = vadd.f32 %v1778_v2, %v701_v45  ;;  %v704_v54 = vmul.f32 %v1776_v1, %v415_v39  ;;  %v705_v55 = vmul.f32 %v1776_v1, %v416_v40  ;;  %v437_v43 = vld [vmem:[%s1769_s13 + $0x700] sm:$0xff] }
  0xc8   : > { %1275 = vst [vmem:[%s1808_s24 + $0x620] sm:$0xff] %v987_v44  ;;  %v706_v56 = vmul.f32 %v1776_v1, %v417_v41  ;;  %1276 = vst [vmem:[%s1808_s24 + $0x628] sm:$0xff] %v988_v48  ;;  %v991_v59 = vadd.f32 %v1778_v2, %v702_v50  ;;  %v992_v60 = vadd.f32 %v1778_v2, %v703_v51  ;;  %v438_v44 = vld [vmem:[%s1769_s13 + $0x708] sm:$0xff]  ;;  %v440_v50 = vld [vmem:[%s1769_s13 + $0x718] sm:$0xff] }
  0xc9   : > { %1277 = vst [vmem:[%s1808_s24 + $0x630] sm:$0xff] %v989_v49  ;;  %v707_v61 = vmul.f32 %v1776_v1, %v418_v46  ;;  %v708_v62 = vmul.f32 %v1776_v1, %v419_v47  ;;  %1278 = vst [vmem:[%s1808_s24 + $0x638] sm:$0xff] %v990_v53  ;;  %v993_v4 = vadd.f32 %v1778_v2, %v704_v54  ;;  %v439_v49 = vld [vmem:[%s1769_s13 + $0x710] sm:$0xff]  ;;  %v441_v51 = vld [vmem:[%s1769_s13 + $0x720] sm:$0xff] }
  0xca   : > { %v994_v5 = vadd.f32 %v1778_v2, %v705_v55  ;;  %v995_v6 = vadd.f32 %v1778_v2, %v706_v56  ;;  %v709_v7 = vmul.f32 %v1776_v1, %v420_v52  ;;  %1279 = vst [vmem:[%s1808_s24 + $0x640] sm:$0xff] %v991_v59  ;;  %1280 = vst [vmem:[%s1808_s24 + $0x648] sm:$0xff] %v992_v60  ;;  %v442_v56 = vld [vmem:[%s1769_s13 + $0x728] sm:$0xff] }
  0xcb   : > { %v996_v10 = vadd.f32 %v1778_v2, %v707_v61  ;;  %v997_v11 = vadd.f32 %v1778_v2, %v708_v62  ;;  %v710_v12 = vmul.f32 %v1776_v1, %v421_v57  ;;  %v711_v13 = vmul.f32 %v1776_v1, %v422_v58  ;;  %1281 = vst [vmem:[%s1808_s24 + $0x650] sm:$0xff] %v993_v4  ;;  %v443_v57 = vld [vmem:[%s1769_s13 + $0x730] sm:$0xff]  ;;  %v444_v62 = vld [vmem:[%s1769_s13 + $0x738] sm:$0xff] }
  0xcc   : > { %1282 = vst [vmem:[%s1808_s24 + $0x658] sm:$0xff] %v994_v5  ;;  %1283 = vst [vmem:[%s1808_s24 + $0x660] sm:$0xff] %v995_v6  ;;  %v998_v15 = vadd.f32 %v1778_v2, %v709_v7  ;;  %v712_v16 = vmul.f32 %v1776_v1, %v423_v63  ;;  %v713_v17 = vmul.f32 %v1776_v1, %v424_v0  ;;  %v445_v5 = vld [vmem:[%s1769_s13 + $0x740] sm:$0xff]  ;;  %v446_v6 = vld [vmem:[%s1769_s13 + $0x748] sm:$0xff] }
  0xcd   : > { %v714_v18 = vmul.f32 %v1776_v1, %v425_v3  ;;  %1284 = vst [vmem:[%s1808_s24 + $0x668] sm:$0xff] %v996_v10  ;;  %1285 = vst [vmem:[%s1808_s24 + $0x670] sm:$0xff] %v997_v11  ;;  %v999_v21 = vadd.f32 %v1778_v2, %v710_v12  ;;  %v1000_v22 = vadd.f32 %v1778_v2, %v711_v13  ;;  %v447_v11 = vld [vmem:[%s1769_s13 + $0x750] sm:$0xff]  ;;  %v448_v12 = vld [vmem:[%s1769_s13 + $0x758] sm:$0xff] }
  0xce   : > { %v715_v23 = vmul.f32 %v1776_v1, %v426_v8  ;;  %v716_v24 = vmul.f32 %v1776_v1, %v427_v9  ;;  %1286 = vst [vmem:[%s1808_s24 + $0x678] sm:$0xff] %v998_v15  ;;  %v1001_v28 = vadd.f32 %v1778_v2, %v712_v16  ;;  %v1002_v29 = vadd.f32 %v1778_v2, %v713_v17  ;;  %v449_v13 = vld [vmem:[%s1769_s13 + $0x760] sm:$0xff] }
  0xcf   : > { %v1003_v30 = vadd.f32 %v1778_v2, %v714_v18  ;;  %v717_v31 = vmul.f32 %v1776_v1, %v428_v14  ;;  %1287 = vst [vmem:[%s1808_s24 + $0x680] sm:$0xff] %v999_v21  ;;  %1288 = vst [vmem:[%s1808_s24 + $0x688] sm:$0xff] %v1000_v22  ;;  %v718_v36 = vmul.f32 %v1776_v1, %v429_v19  ;;  %v450_v18 = vld [vmem:[%s1769_s13 + $0x768] sm:$0xff]  ;;  %v451_v19 = vld [vmem:[%s1769_s13 + $0x770] sm:$0xff] }
  0xd0   : > { %v1004_v34 = vadd.f32 %v1778_v2, %v715_v23  ;;  %v1005_v35 = vadd.f32 %v1778_v2, %v716_v24  ;;  %v719_v37 = vmul.f32 %v1776_v1, %v430_v20  ;;  %1289 = vst [vmem:[%s1808_s24 + $0x690] sm:$0xff] %v1001_v28  ;;  %1290 = vst [vmem:[%s1808_s24 + $0x698] sm:$0xff] %v1002_v29  ;;  %v452_v24 = vld [vmem:[%s1769_s13 + $0x778] sm:$0xff]  ;;  %v453_v29 = vld [vmem:[%s1769_s13 + $0x780] sm:$0xff] }
  0xd1   : > { %1291 = vst [vmem:[%s1808_s24 + $0x6a0] sm:$0xff] %v1003_v30  ;;  %v1006_v39 = vadd.f32 %v1778_v2, %v717_v31  ;;  %v720_v40 = vmul.f32 %v1776_v1, %v431_v25  ;;  %v721_v41 = vmul.f32 %v1776_v1, %v432_v26  ;;  %v722_v42 = vmul.f32 %v1776_v1, %v433_v27  ;;  %v454_v30 = vld [vmem:[%s1769_s13 + $0x788] sm:$0xff] }
  0xd2   : > { %1292 = vst [vmem:[%s1808_s24 + $0x6a8] sm:$0xff] %v1004_v34  ;;  %1293 = vst [vmem:[%s1808_s24 + $0x6b0] sm:$0xff] %v1005_v35  ;;  %v1007_v45 = vadd.f32 %v1778_v2, %v718_v36  ;;  %v1008_v46 = vadd.f32 %v1778_v2, %v719_v37  ;;  %v723_v47 = vmul.f32 %v1776_v1, %v434_v32  ;;  %v455_v35 = vld [vmem:[%s1769_s13 + $0x790] sm:$0xff]  ;;  %v456_v36 = vld [vmem:[%s1769_s13 + $0x798] sm:$0xff] }
  0xd3   : > { %v724_v48 = vmul.f32 %v1776_v1, %v435_v33  ;;  %1294 = vst [vmem:[%s1808_s24 + $0x6b8] sm:$0xff] %v1006_v39  ;;  %v1009_v52 = vadd.f32 %v1778_v2, %v720_v40  ;;  %v1010_v53 = vadd.f32 %v1778_v2, %v721_v41  ;;  %v1011_v54 = vadd.f32 %v1778_v2, %v722_v42  ;;  %v457_v37 = vld [vmem:[%s1769_s13 + $0x7a0] sm:$0xff]  ;;  %v458_v42 = vld [vmem:[%s1769_s13 + $0x7a8] sm:$0xff] }
  0xd4   : > { %v725_v55 = vmul.f32 %v1776_v1, %v436_v38  ;;  %1295 = vst [vmem:[%s1808_s24 + $0x6c0] sm:$0xff] %v1007_v45  ;;  %1296 = vst [vmem:[%s1808_s24 + $0x6c8] sm:$0xff] %v1008_v46  ;;  %v1012_v58 = vadd.f32 %v1778_v2, %v723_v47  ;;  %v726_v60 = vmul.f32 %v1776_v1, %v437_v43  ;;  %v459_v43 = vld [vmem:[%s1769_s13 + $0x7b0] sm:$0xff] }
  0xd5   : > { %v1013_v59 = vadd.f32 %v1778_v2, %v724_v48  ;;  %v727_v61 = vmul.f32 %v1776_v1, %v438_v44  ;;  %1297 = vst [vmem:[%s1808_s24 + $0x6d0] sm:$0xff] %v1009_v52  ;;  %1298 = vst [vmem:[%s1808_s24 + $0x6d8] sm:$0xff] %v1010_v53  ;;  %v728_v0 = vmul.f32 %v1776_v1, %v439_v49  ;;  %v460_v48 = vld [vmem:[%s1769_s13 + $0x7b8] sm:$0xff]  ;;  %v461_v53 = vld [vmem:[%s1769_s13 + $0x7c0] sm:$0xff] }
  0xd6   : > { %1299 = vst [vmem:[%s1808_s24 + $0x6e0] sm:$0xff] %v1011_v54  ;;  %v1014_v63 = vadd.f32 %v1778_v2, %v725_v55  ;;  %v729_v3 = vmul.f32 %v1776_v1, %v440_v50  ;;  %v730_v4 = vmul.f32 %v1776_v1, %v441_v51  ;;  %1300 = vst [vmem:[%s1808_s24 + $0x6e8] sm:$0xff] %v1012_v58  ;;  %v462_v54 = vld [vmem:[%s1769_s13 + $0x7c8] sm:$0xff] }
  0xd7   : > { %1301 = vst [vmem:[%s1808_s24 + $0x6f0] sm:$0xff] %v1013_v59  ;;  %v1015_v7 = vadd.f32 %v1778_v2, %v726_v60  ;;  %v1016_v8 = vadd.f32 %v1778_v2, %v727_v61  ;;  %v731_v9 = vmul.f32 %v1776_v1, %v442_v56  ;;  %v732_v10 = vmul.f32 %v1776_v1, %v443_v57  ;;  %v463_v59 = vld [vmem:[%s1769_s13 + $0x7d0] sm:$0xff]  ;;  %v464_v60 = vld [vmem:[%s1769_s13 + $0x7d8] sm:$0xff]  ;;  %v465_v61 = vld [vmem:[%s1769_s13 + $0x7e0] sm:$0xff] }
  0xd8   : > { %1302 = vst [vmem:[%s1808_s24 + $0x6f8] sm:$0xff] %v1014_v63  ;;  %v1017_v14 = vadd.f32 %v1778_v2, %v728_v0  ;;  %v1018_v15 = vadd.f32 %v1778_v2, %v729_v3  ;;  %v1019_v16 = vadd.f32 %v1778_v2, %v730_v4  ;;  %v733_v17 = vmul.f32 %v1776_v1, %v444_v62  ;;  %v466_v4 = vld [vmem:[%s1769_s13 + $0x7e8] sm:$0xff] }
  0xd9   : > { %1303 = vst [vmem:[%s1808_s24 + $0x700] sm:$0xff] %v1015_v7  ;;  %1304 = vst [vmem:[%s1808_s24 + $0x708] sm:$0xff] %v1016_v8  ;;  %v1020_v20 = vadd.f32 %v1778_v2, %v731_v9  ;;  %v1021_v21 = vadd.f32 %v1778_v2, %v732_v10  ;;  %v734_v22 = vmul.f32 %v1776_v1, %v445_v5  ;;  %v467_v5 = vld [vmem:[%s1769_s13 + $0x7f0] sm:$0xff]  ;;  %v468_v10 = vld [vmem:[%s1769_s13 + $0x7f8] sm:$0xff] }
  0xda   : > { %v735_v23 = vmul.f32 %v1776_v1, %v446_v6  ;;  %1305 = vst [vmem:[%s1808_s24 + $0x710] sm:$0xff] %v1017_v14  ;;  %1306 = vst [vmem:[%s1808_s24 + $0x718] sm:$0xff] %v1018_v15  ;;  %v1022_v25 = vadd.f32 %v1778_v2, %v733_v17  ;;  %v736_v26 = vmul.f32 %v1776_v1, %v447_v11  ;;  %v469_v15 = vld [vmem:[%s1769_s13 + $0x800] sm:$0xff] }
  0xdb   : > { %1307 = vst [vmem:[%s1808_s24 + $0x720] sm:$0xff] %v1019_v16  ;;  %v737_v27 = vmul.f32 %v1776_v1, %v448_v12  ;;  %v738_v28 = vmul.f32 %v1776_v1, %v449_v13  ;;  %1308 = vst [vmem:[%s1808_s24 + $0x728] sm:$0xff] %v1020_v20  ;;  %v1023_v31 = vadd.f32 %v1778_v2, %v734_v22  ;;  %v470_v16 = vld [vmem:[%s1769_s13 + $0x808] sm:$0xff]  ;;  %v472_v22 = vld [vmem:[%s1769_s13 + $0x818] sm:$0xff] }
  0xdc   : > { %1309 = vst [vmem:[%s1808_s24 + $0x730] sm:$0xff] %v1021_v21  ;;  %v1024_v32 = vadd.f32 %v1778_v2, %v735_v23  ;;  %v739_v33 = vmul.f32 %v1776_v1, %v450_v18  ;;  %v740_v34 = vmul.f32 %v1776_v1, %v451_v19  ;;  %1310 = vst [vmem:[%s1808_s24 + $0x738] sm:$0xff] %v1022_v25  ;;  %v471_v21 = vld [vmem:[%s1769_s13 + $0x810] sm:$0xff]  ;;  %v473_v23 = vld [vmem:[%s1769_s13 + $0x820] sm:$0xff] }
  0xdd   : > { %v1025_v38 = vadd.f32 %v1778_v2, %v736_v26  ;;  %v1026_v39 = vadd.f32 %v1778_v2, %v737_v27  ;;  %v1027_v40 = vadd.f32 %v1778_v2, %v738_v28  ;;  %v741_v41 = vmul.f32 %v1776_v1, %v452_v24  ;;  %1311 = vst [vmem:[%s1808_s24 + $0x740] sm:$0xff] %v1023_v31  ;;  %v474_v28 = vld [vmem:[%s1769_s13 + $0x828] sm:$0xff] }
  0xde   : > { %1312 = vst [vmem:[%s1808_s24 + $0x748] sm:$0xff] %v1024_v32  ;;  %v1028_v44 = vadd.f32 %v1778_v2, %v739_v33  ;;  %v1029_v45 = vadd.f32 %v1778_v2, %v740_v34  ;;  %v742_v46 = vmul.f32 %v1776_v1, %v453_v29  ;;  %v743_v47 = vmul.f32 %v1776_v1, %v454_v30  ;;  %v475_v29 = vld [vmem:[%s1769_s13 + $0x830] sm:$0xff]  ;;  %v476_v34 = vld [vmem:[%s1769_s13 + $0x838] sm:$0xff] }
  0xdf   : > { %1313 = vst [vmem:[%s1808_s24 + $0x750] sm:$0xff] %v1025_v38  ;;  %1314 = vst [vmem:[%s1808_s24 + $0x758] sm:$0xff] %v1026_v39  ;;  %v1030_v49 = vadd.f32 %v1778_v2, %v741_v41  ;;  %v744_v50 = vmul.f32 %v1776_v1, %v455_v35  ;;  %v745_v51 = vmul.f32 %v1776_v1, %v456_v36  ;;  %v477_v39 = vld [vmem:[%s1769_s13 + $0x840] sm:$0xff] }
  0xe0   : > { %1315 = vst [vmem:[%s1808_s24 + $0x760] sm:$0xff] %v1027_v40  ;;  %v746_v52 = vmul.f32 %v1776_v1, %v457_v37  ;;  %1316 = vst [vmem:[%s1808_s24 + $0x768] sm:$0xff] %v1028_v44  ;;  %v1031_v55 = vadd.f32 %v1778_v2, %v742_v46  ;;  %v1032_v56 = vadd.f32 %v1778_v2, %v743_v47  ;;  %v478_v40 = vld [vmem:[%s1769_s13 + $0x848] sm:$0xff]  ;;  %v480_v46 = vld [vmem:[%s1769_s13 + $0x858] sm:$0xff] }
  0xe1   : > { %1317 = vst [vmem:[%s1808_s24 + $0x770] sm:$0xff] %v1029_v45  ;;  %v747_v57 = vmul.f32 %v1776_v1, %v458_v42  ;;  %v748_v58 = vmul.f32 %v1776_v1, %v459_v43  ;;  %1318 = vst [vmem:[%s1808_s24 + $0x778] sm:$0xff] %v1030_v49  ;;  %v1033_v62 = vadd.f32 %v1778_v2, %v744_v50  ;;  %v479_v45 = vld [vmem:[%s1769_s13 + $0x850] sm:$0xff]  ;;  %v481_v47 = vld [vmem:[%s1769_s13 + $0x860] sm:$0xff] }
  0xe2   : > { %v1034_v63 = vadd.f32 %v1778_v2, %v745_v51  ;;  %v1035_v0 = vadd.f32 %v1778_v2, %v746_v52  ;;  %v749_v3 = vmul.f32 %v1776_v1, %v460_v48  ;;  %1319 = vst [vmem:[%s1808_s24 + $0x780] sm:$0xff] %v1031_v55  ;;  %1320 = vst [vmem:[%s1808_s24 + $0x788] sm:$0xff] %v1032_v56  ;;  %v482_v52 = vld [vmem:[%s1769_s13 + $0x868] sm:$0xff] }
  0xe3   : > { %v1036_v6 = vadd.f32 %v1778_v2, %v747_v57  ;;  %v1037_v7 = vadd.f32 %v1778_v2, %v748_v58  ;;  %v750_v8 = vmul.f32 %v1776_v1, %v461_v53  ;;  %v751_v9 = vmul.f32 %v1776_v1, %v462_v54  ;;  %1321 = vst [vmem:[%s1808_s24 + $0x790] sm:$0xff] %v1033_v62  ;;  %v483_v53 = vld [vmem:[%s1769_s13 + $0x870] sm:$0xff]  ;;  %v484_v58 = vld [vmem:[%s1769_s13 + $0x878] sm:$0xff] }
  0xe4   : > { %1322 = vst [vmem:[%s1808_s24 + $0x798] sm:$0xff] %v1034_v63  ;;  %1323 = vst [vmem:[%s1808_s24 + $0x7a0] sm:$0xff] %v1035_v0  ;;  %v1038_v11 = vadd.f32 %v1778_v2, %v749_v3  ;;  %v752_v12 = vmul.f32 %v1776_v1, %v463_v59  ;;  %v753_v13 = vmul.f32 %v1776_v1, %v464_v60  ;;  %v485_v63 = vld [vmem:[%s1769_s13 + $0x880] sm:$0xff]  ;;  %v486_v0 = vld [vmem:[%s1769_s13 + $0x888] sm:$0xff] }
  0xe5   : > { %v754_v14 = vmul.f32 %v1776_v1, %v465_v61  ;;  %1324 = vst [vmem:[%s1808_s24 + $0x7a8] sm:$0xff] %v1036_v6  ;;  %1325 = vst [vmem:[%s1808_s24 + $0x7b0] sm:$0xff] %v1037_v7  ;;  %v1039_v17 = vadd.f32 %v1778_v2, %v750_v8  ;;  %v1040_v18 = vadd.f32 %v1778_v2, %v751_v9  ;;  %v487_v7 = vld [vmem:[%s1769_s13 + $0x890] sm:$0xff]  ;;  %v488_v8 = vld [vmem:[%s1769_s13 + $0x898] sm:$0xff] }
  0xe6   : > { %v755_v19 = vmul.f32 %v1776_v1, %v466_v4  ;;  %v756_v20 = vmul.f32 %v1776_v1, %v467_v5  ;;  %1326 = vst [vmem:[%s1808_s24 + $0x7b8] sm:$0xff] %v1038_v11  ;;  %v1041_v24 = vadd.f32 %v1778_v2, %v752_v12  ;;  %v1042_v25 = vadd.f32 %v1778_v2, %v753_v13  ;;  %v489_v9 = vld [vmem:[%s1769_s13 + $0x8a0] sm:$0xff] }
  0xe7   : > { %v1043_v26 = vadd.f32 %v1778_v2, %v754_v14  ;;  %v757_v27 = vmul.f32 %v1776_v1, %v468_v10  ;;  %1327 = vst [vmem:[%s1808_s24 + $0x7c0] sm:$0xff] %v1039_v17  ;;  %1328 = vst [vmem:[%s1808_s24 + $0x7c8] sm:$0xff] %v1040_v18  ;;  %v758_v32 = vmul.f32 %v1776_v1, %v469_v15  ;;  %v490_v14 = vld [vmem:[%s1769_s13 + $0x8a8] sm:$0xff]  ;;  %v491_v15 = vld [vmem:[%s1769_s13 + $0x8b0] sm:$0xff] }
  0xe8   : > { %v1044_v30 = vadd.f32 %v1778_v2, %v755_v19  ;;  %v1045_v31 = vadd.f32 %v1778_v2, %v756_v20  ;;  %v759_v33 = vmul.f32 %v1776_v1, %v470_v16  ;;  %1329 = vst [vmem:[%s1808_s24 + $0x7d0] sm:$0xff] %v1041_v24  ;;  %1330 = vst [vmem:[%s1808_s24 + $0x7d8] sm:$0xff] %v1042_v25  ;;  %v492_v20 = vld [vmem:[%s1769_s13 + $0x8b8] sm:$0xff]  ;;  %v493_v25 = vld [vmem:[%s1769_s13 + $0x8c0] sm:$0xff] }
  0xe9   : > { %1331 = vst [vmem:[%s1808_s24 + $0x7e0] sm:$0xff] %v1043_v26  ;;  %v1046_v35 = vadd.f32 %v1778_v2, %v757_v27  ;;  %v760_v36 = vmul.f32 %v1776_v1, %v471_v21  ;;  %v761_v37 = vmul.f32 %v1776_v1, %v472_v22  ;;  %v762_v38 = vmul.f32 %v1776_v1, %v473_v23  ;;  %v494_v26 = vld [vmem:[%s1769_s13 + $0x8c8] sm:$0xff] }
  0xea   : > { %1332 = vst [vmem:[%s1808_s24 + $0x7e8] sm:$0xff] %v1044_v30  ;;  %1333 = vst [vmem:[%s1808_s24 + $0x7f0] sm:$0xff] %v1045_v31  ;;  %v1047_v41 = vadd.f32 %v1778_v2, %v758_v32  ;;  %v1048_v42 = vadd.f32 %v1778_v2, %v759_v33  ;;  %v763_v43 = vmul.f32 %v1776_v1, %v474_v28  ;;  %v495_v31 = vld [vmem:[%s1769_s13 + $0x8d0] sm:$0xff]  ;;  %v496_v32 = vld [vmem:[%s1769_s13 + $0x8d8] sm:$0xff] }
  0xeb   : > { %v764_v44 = vmul.f32 %v1776_v1, %v475_v29  ;;  %1334 = vst [vmem:[%s1808_s24 + $0x7f8] sm:$0xff] %v1046_v35  ;;  %v1049_v48 = vadd.f32 %v1778_v2, %v760_v36  ;;  %v1050_v49 = vadd.f32 %v1778_v2, %v761_v37  ;;  %v1051_v50 = vadd.f32 %v1778_v2, %v762_v38  ;;  %v497_v33 = vld [vmem:[%s1769_s13 + $0x8e0] sm:$0xff]  ;;  %v498_v38 = vld [vmem:[%s1769_s13 + $0x8e8] sm:$0xff] }
  0xec   : > { %v765_v51 = vmul.f32 %v1776_v1, %v476_v34  ;;  %1335 = vst [vmem:[%s1808_s24 + $0x800] sm:$0xff] %v1047_v41  ;;  %1336 = vst [vmem:[%s1808_s24 + $0x808] sm:$0xff] %v1048_v42  ;;  %v1052_v54 = vadd.f32 %v1778_v2, %v763_v43  ;;  %v766_v56 = vmul.f32 %v1776_v1, %v477_v39  ;;  %v499_v39 = vld [vmem:[%s1769_s13 + $0x8f0] sm:$0xff] }
  0xed   : > { %v1053_v55 = vadd.f32 %v1778_v2, %v764_v44  ;;  %v767_v57 = vmul.f32 %v1776_v1, %v478_v40  ;;  %1337 = vst [vmem:[%s1808_s24 + $0x810] sm:$0xff] %v1049_v48  ;;  %1338 = vst [vmem:[%s1808_s24 + $0x818] sm:$0xff] %v1050_v49  ;;  %v768_v60 = vmul.f32 %v1776_v1, %v479_v45  ;;  %v500_v44 = vld [vmem:[%s1769_s13 + $0x8f8] sm:$0xff] }
  0xee   : > { %1339 = vst [vmem:[%s1808_s24 + $0x820] sm:$0xff] %v1051_v50  ;;  %v1054_v59 = vadd.f32 %v1778_v2, %v765_v51  ;;  %v769_v61 = vmul.f32 %v1776_v1, %v480_v46  ;;  %v770_v62 = vmul.f32 %v1776_v1, %v481_v47  ;;  %1340 = vst [vmem:[%s1808_s24 + $0x828] sm:$0xff] %v1052_v54 }
  0xef   : > { %1341 = vst [vmem:[%s1808_s24 + $0x830] sm:$0xff] %v1053_v55  ;;  %v1055_v3 = vadd.f32 %v1778_v2, %v766_v56  ;;  %v1056_v4 = vadd.f32 %v1778_v2, %v767_v57  ;;  %v771_v5 = vmul.f32 %v1776_v1, %v482_v52  ;;  %v772_v6 = vmul.f32 %v1776_v1, %v483_v53 }
  0xf0   : > { %1342 = vst [vmem:[%s1808_s24 + $0x838] sm:$0xff] %v1054_v59  ;;  %v1057_v10 = vadd.f32 %v1778_v2, %v768_v60  ;;  %v1058_v11 = vadd.f32 %v1778_v2, %v769_v61  ;;  %v1059_v12 = vadd.f32 %v1778_v2, %v770_v62  ;;  %v773_v13 = vmul.f32 %v1776_v1, %v484_v58 }
  0xf1   : > { %1343 = vst [vmem:[%s1808_s24 + $0x840] sm:$0xff] %v1055_v3  ;;  %1344 = vst [vmem:[%s1808_s24 + $0x848] sm:$0xff] %v1056_v4  ;;  %v1060_v16 = vadd.f32 %v1778_v2, %v771_v5  ;;  %v1061_v17 = vadd.f32 %v1778_v2, %v772_v6  ;;  %v774_v18 = vmul.f32 %v1776_v1, %v485_v63 }
  0xf2   : > { %v775_v19 = vmul.f32 %v1776_v1, %v486_v0  ;;  %1345 = vst [vmem:[%s1808_s24 + $0x850] sm:$0xff] %v1057_v10  ;;  %1346 = vst [vmem:[%s1808_s24 + $0x858] sm:$0xff] %v1058_v11  ;;  %v1062_v21 = vadd.f32 %v1778_v2, %v773_v13  ;;  %v776_v22 = vmul.f32 %v1776_v1, %v487_v7 }
  0xf3   : > { %1347 = vst [vmem:[%s1808_s24 + $0x860] sm:$0xff] %v1059_v12  ;;  %v777_v23 = vmul.f32 %v1776_v1, %v488_v8  ;;  %v778_v24 = vmul.f32 %v1776_v1, %v489_v9  ;;  %1348 = vst [vmem:[%s1808_s24 + $0x868] sm:$0xff] %v1060_v16  ;;  %v1063_v27 = vadd.f32 %v1778_v2, %v774_v18 }
  0xf4   : > { %1349 = vst [vmem:[%s1808_s24 + $0x870] sm:$0xff] %v1061_v17  ;;  %v1064_v28 = vadd.f32 %v1778_v2, %v775_v19  ;;  %v779_v29 = vmul.f32 %v1776_v1, %v490_v14  ;;  %v780_v30 = vmul.f32 %v1776_v1, %v491_v15  ;;  %1350 = vst [vmem:[%s1808_s24 + $0x878] sm:$0xff] %v1062_v21 }
  0xf5   : > { %v1065_v34 = vadd.f32 %v1778_v2, %v776_v22  ;;  %v1066_v35 = vadd.f32 %v1778_v2, %v777_v23  ;;  %v1067_v36 = vadd.f32 %v1778_v2, %v778_v24  ;;  %v781_v37 = vmul.f32 %v1776_v1, %v492_v20  ;;  %1351 = vst [vmem:[%s1808_s24 + $0x880] sm:$0xff] %v1063_v27 }
  0xf6   : > { %1352 = vst [vmem:[%s1808_s24 + $0x888] sm:$0xff] %v1064_v28  ;;  %v1068_v40 = vadd.f32 %v1778_v2, %v779_v29  ;;  %v1069_v41 = vadd.f32 %v1778_v2, %v780_v30  ;;  %v782_v42 = vmul.f32 %v1776_v1, %v493_v25  ;;  %v783_v43 = vmul.f32 %v1776_v1, %v494_v26 }
  0xf7   : > { %1353 = vst [vmem:[%s1808_s24 + $0x890] sm:$0xff] %v1065_v34  ;;  %1354 = vst [vmem:[%s1808_s24 + $0x898] sm:$0xff] %v1066_v35  ;;  %v1070_v45 = vadd.f32 %v1778_v2, %v781_v37  ;;  %v784_v46 = vmul.f32 %v1776_v1, %v495_v31  ;;  %v785_v47 = vmul.f32 %v1776_v1, %v496_v32 }
  0xf8   : > { %1355 = vst [vmem:[%s1808_s24 + $0x8a0] sm:$0xff] %v1067_v36  ;;  %v786_v48 = vmul.f32 %v1776_v1, %v497_v33  ;;  %1356 = vst [vmem:[%s1808_s24 + $0x8a8] sm:$0xff] %v1068_v40  ;;  %v1071_v49 = vadd.f32 %v1778_v2, %v782_v42  ;;  %v1072_v50 = vadd.f32 %v1778_v2, %v783_v43  ;;  %1374 = sbr.rel (!%p1707_p9) target bundleno = 283 (0x11b), region = 40 }
  0xf9   : > { %1357 = vst [vmem:[%s1808_s24 + $0x8b0] sm:$0xff] %v1069_v41  ;;  %v787_v51 = vmul.f32 %v1776_v1, %v498_v38  ;;  %v788_v52 = vmul.f32 %v1776_v1, %v499_v39  ;;  %1358 = vst [vmem:[%s1808_s24 + $0x8b8] sm:$0xff] %v1070_v45  ;;  %v1073_v53 = vadd.f32 %v1778_v2, %v784_v46 }
  0xfa   : > { %v1074_v54 = vadd.f32 %v1778_v2, %v785_v47  ;;  %v1075_v55 = vadd.f32 %v1778_v2, %v786_v48  ;;  %v789_v56 = vmul.f32 %v1776_v1, %v500_v44  ;;  %1359 = vst [vmem:[%s1808_s24 + $0x8c0] sm:$0xff] %v1071_v49  ;;  %1360 = vst [vmem:[%s1808_s24 + $0x8c8] sm:$0xff] %v1072_v50 }
  0xfb   : > { %v1076_v57 = vadd.f32 %v1778_v2, %v787_v51  ;;  %v1077_v58 = vadd.f32 %v1778_v2, %v788_v52  ;;  %1361 = vst [vmem:[%s1808_s24 + $0x8d0] sm:$0xff] %v1073_v53 }
  0xfc   : > { %1362 = vst [vmem:[%s1808_s24 + $0x8d8] sm:$0xff] %v1074_v54  ;;  %1363 = vst [vmem:[%s1808_s24 + $0x8e0] sm:$0xff] %v1075_v55  ;;  %v1078_v59 = vadd.f32 %v1778_v2, %v789_v56 }
  0xfd   : > { %1364 = vst [vmem:[%s1808_s24 + $0x8e8] sm:$0xff] %v1076_v57  ;;  %1365 = vst [vmem:[%s1808_s24 + $0x8f0] sm:$0xff] %v1077_v58 }
  0xfe   : > { %1366 = vst [vmem:[%s1808_s24 + $0x8f8] sm:$0xff] %v1078_v59 }
  0xff   : > { %s3015_s14 = smov (!%p1377_p6, %s1376_s14), 9 }
 0x100   : > { %s2939_s15 = sshll.u32 %s3015_s14, 12 }
 0x101   : > { %s1382_s1 = ssub.s32 36864, %s2939_s15 }
 0x102   : > { %1383 = vsyncadd %s1368_s9, %s1382_s1  ;;  %p1475_p10 = scmp.ne.s32.totalorder %s2939_s15, 0  ;;  %s1489_s25 = smul.u32 36864, %s1684_s0 }
 0x103   : > { %s1389_s21 = sshll.u32 %s1808_s24, 4  ;;  %s1634_s30 = smov [#allocation7]   ;;  %s2952_s21 = int_to_ptr.vmem [resolvable:$true] %s1389_s21 }
 0x104   : > { %s2950_s28 = scalar_lea.hbm %s3001_s3, %s1489_s25  ;;  %s1563_s29 = scalar_lea.vmem %s2952_s21, %s2939_s15 }
 0x105   : > { %p1564_p9 = scmp.ne.s32.totalorder %s2952_s21, %s1563_s29  ;;  %s1567_s5 = sshll.u32 %s1634_s30, 4  ;;  %s1568_s5 = int_to_ptr.vmem [resolvable:$false] %s1567_s5 }
 0x106   : > { %s1569_s0 = scalar_lea.vmem %s1568_s5, 73728  ;;  %p1570_p12 = scmp.lt.s32.totalorder %s2952_s21, %s1568_s5 }
 0x107   : > { %p1565_p11 = pnand %p1564_p9, %p1475_p10  ;;  %p1571_p0 = scmp.lt.s32.totalorder %s1569_s0, %s1563_s29 }
 0x109   : > { %p1566_p13 = pneg %p1565_p11  ;;  %p1572_p1 = por %p1571_p0, %p1570_p12 }
 0x10b   : > { %p1573_p3 = pnand %p1572_p1, %p1566_p13 }
 0x10d   : > { %1576 = shalt.err (!%p1573_p3)
}
 0x10e   : > { %s1577_s7 = scalar_lea.hbm %s2950_s28, %s2939_s15  ;;  %s1581_s13 = scalar_lea.hbm %s3001_s3, 69632 }
 0x10f   : > { %p1578_p4 = scmp.ne.s32.totalorder %s2950_s28, %s1577_s7  ;;  %p1582_p7 = scmp.lt.u32.totalorder %s2950_s28, %s3001_s3 }
 0x110   : > { %p1583_p8 = scmp.lt.u32.totalorder %s1581_s13, %s1577_s7  ;;  %p1585_p9 = scmp.lt.u32.totalorder %s1577_s7, %s2950_s28 }
 0x111   : > { %p1579_p5 = pnand %p1578_p4, %p1475_p10 }
 0x112   : > { %p1584_p6 = por %p1583_p8, %p1582_p7 }
 0x113   : > { %p1580_p2 = pneg %p1579_p5 }
 0x114   : > { %p1586_p11 = por %p1585_p9, %p1584_p6 }
 0x116   : > { %p1587_p13 = pnand %p1586_p11, %p1580_p2 }
 0x118   : > { %1590 = shalt.err (!%p1587_p13)
}
 0x119   : > { %s1635_s24 = smov 4096   ;;  %s1636_s12 = smov 256  }
 0x11a   : > { %1395 = dma.vmem_to_hbm [thread:$0]  (%p1475_p10), %s2952_s21, %s2939_s15, %s2950_s28, %s1368_s9, %s1635_s24, %s1635_s24, %s1636_s12  }
 0x11b PF: > { %s1404_s14 = sand.u32 1, %s1617_s16   ;;  %p3006_p12 = scmp.ne.s32.totalorder %s3005_s26, 0 }
 0x11c   : > { %p3007_p0 = scmp.ge.s32.totalorder %s1629_s19, 2  ;;  %s1405_s1 = scalar_lea.sflag [#allocation6], %s1404_s14 }
 0x11e   : > { %p1495_p1 = pnand %p3007_p0, %p3006_p12 }
 0x120   : > { %1612 = dma.done.wait (!%p1495_p1), %s1405_s1, 36864  }
 0x121   : > { %1614 = vsyncadd (!%p1495_p1), %s1405_s1, 4294930432  ;;  %p18_p3 = scmp.ge.s32.totalorder %s1688_s20, 4   ;;  %s3008_s16 = smov %s1621_s17 }
 0x122   : > { %s3009_s17 = smov %s1625_s18  ;;  %s3010_s18 = smov %s1700_s23 }
 0x123   : > { %s3011_s19 = smov %s1688_s20  ;;  %20 = sbr.rel (!%p18_p3) target bundleno = 8 (0x8), region = 77 }
 0x12a   :  { %1410 = vsyncpa [#allocation5], 1 }
 0x12b   :  { %1412 = vsyncpa [#allocation5 + $0x1], 1 }
 0x12c   :  { %1413 = vsyncpa [#allocation6], 1 }
 0x12d   :  { %1415 = vsyncpa [#allocation6 + $0x1], 1 }

</bundles_post_ra>
